<compile_context>
chip_gen: v6e
topology: v6e:2x2x1
jax: 0.10.0
libtpu: 0.0.40
codegen_flags: <defaults>
</compile_context>

<pallas_src>
import functools

import jax
import jax.numpy as jnp
from jax.experimental import pallas as pl
from jax.experimental.pallas import tpu as pltpu


def _start_gather(idx_ref, emb_hbm, rows, sems, step, slot, tile_bt):
    """Issue `tile_bt` row DMAs (token ids read from SMEM) HBM -> VMEM slot."""
    base = step * tile_bt
    for r in range(tile_bt):
        tok = idx_ref[base + r]
        pltpu.make_async_copy(
            emb_hbm.at[pl.ds(tok, 1), :],
            rows.at[pl.ds(slot * tile_bt + r, 1), :],
            sems.at[slot, r],
        ).start()


def _wait_gather(emb_hbm, rows, sems, slot, tile_bt):
    """Wait for the `tile_bt` row DMAs previously issued into VMEM slot."""
    for r in range(tile_bt):
        pltpu.make_async_copy(
            emb_hbm.at[pl.ds(0, 1), :],        # shape-only descriptor for the wait
            rows.at[pl.ds(slot * tile_bt + r, 1), :],
            sems.at[slot, r],
        ).wait()


def _bigram_loss_kernel(idx_ref, tgt_ref, emb_hbm, logits_ref, loss_ref,
                        rows, sems, *, tile_bt, vocab, n_rows):
    i = pl.program_id(0)
    nprog = pl.num_programs(0)
    slot = i & 1

    @pl.when(i == 0)
    def _init():
        loss_ref[...] = jnp.zeros_like(loss_ref)
        _start_gather(idx_ref, emb_hbm, rows, sems, 0, 0, tile_bt)   # prime slot 0

    # Rows for this tile (issued in the previous grid step, or by the prime above).
    _wait_gather(emb_hbm, rows, sems, slot, tile_bt)

    # Prefetch the next tile's rows into the other slot; hides behind CE + writeback.
    @pl.when(i + 1 < nprog)
    def _prefetch():
        _start_gather(idx_ref, emb_hbm, rows, sems, i + 1, 1 - slot, tile_bt)

    base_row = pl.multiple_of(slot * tile_bt, tile_bt)
    logits = rows[pl.ds(base_row, tile_bt), :]      # (tile_bt, V_pad) f32
    logits_ref[...] = logits                        # lane-dense (multiple-of-128) store

    v_pad = logits.shape[-1]
    cols = jax.lax.broadcasted_iota(jnp.int32, (tile_bt, v_pad), 1)
    lane_ok = cols < vocab

    # Numerically stable log-sum-exp restricted to the real vocab lanes.
    masked = jnp.where(lane_ok, logits, jnp.float32(-1e30))
    m = jnp.max(masked, axis=-1, keepdims=True)                       # (tile_bt, 1)
    p = jnp.where(lane_ok, jnp.exp(masked - m), 0.0)
    lse = m + jnp.log(jnp.sum(p, axis=-1, keepdims=True))             # (tile_bt, 1)

    # Target logit via a lane compare (no dynamic lane extraction).
    picked = jnp.sum(jnp.where(cols == tgt_ref[...], logits, 0.0),
                     axis=-1, keepdims=True)                          # (tile_bt, 1)

    # Rows past the true B*T (grid padding) contribute nothing.
    row_ids = i * tile_bt + jax.lax.broadcasted_iota(jnp.int32, (tile_bt, 1), 0)
    per_row = jnp.where(row_ids < n_rows, lse - picked, 0.0)

    loss_ref[...] += jnp.sum(per_row, axis=0, keepdims=True)

    @pl.when(i == nprog - 1)
    def _finalize():
        loss_ref[...] = loss_ref[...] * jnp.float32(1.0 / n_rows)


def _bigram_logits_kernel(idx_ref, emb_hbm, logits_ref, rows, sems, *, tile_bt):
    i = pl.program_id(0)
    nprog = pl.num_programs(0)
    slot = i & 1

    @pl.when(i == 0)
    def _prime():
        _start_gather(idx_ref, emb_hbm, rows, sems, 0, 0, tile_bt)

    _wait_gather(emb_hbm, rows, sems, slot, tile_bt)

    @pl.when(i + 1 < nprog)
    def _prefetch():
        _start_gather(idx_ref, emb_hbm, rows, sems, i + 1, 1 - slot, tile_bt)

    base_row = pl.multiple_of(slot * tile_bt, tile_bt)
    logits_ref[...] = rows[pl.ds(base_row, tile_bt), :]


def _round_up(x, m):
    return (x + m - 1) // m * m


def _bigram_pallas(idx_flat, emb, tgt_flat=None, *, tile_bt=None):
    """idx_flat/tgt_flat: (BT,) int ids; emb: (V, V) f32.  Returns (logits, loss|None)."""
    bt = idx_flat.shape[0]
    v = emb.shape[0]
    v_pad = _round_up(v, 128)                   # lane-dense logits / table rows

    if tile_bt is None:
        # Tiny tiles for demo shapes (exercises multi-tile accumulation + prefetch);
        # at real sizes use the largest tile that keeps scratch + pipelined output
        # buffers inside ~24 MiB of VMEM (64 MiB total on v7x, 128 MiB on v5e/v6e).
        budget = 24 * 1024 * 1024
        cap = max(8, (budget // (16 * v_pad)) // 8 * 8)
        tile_bt = min(8 if bt <= 64 else 256, cap)
    bt_pad = _round_up(bt, tile_bt)
    grid = (bt_pad // tile_bt,)

    # Token ids -> SMEM scalar prefetch (drives the gather-DMA addressing).
    idx_pad = jnp.pad(jnp.clip(idx_flat.astype(jnp.int32), 0, v - 1),
                      (0, bt_pad - bt))
    # Lane-pad the table once so each gathered row is a full 128-lane slab.
    emb_pad = jnp.pad(emb.astype(jnp.float32), ((0, 0), (0, v_pad - v)))

    scratch = [
        pltpu.VMEM((2 * tile_bt, v_pad), jnp.float32),   # double-buffered gathered rows
        pltpu.SemaphoreType.DMA((2, tile_bt)),           # one DMA semaphore per slot/row
    ]
    compiler_params = pltpu.CompilerParams(
        dimension_semantics=("arbitrary",),   # sequential: prefetch carry + loss accum
        vmem_limit_bytes=64 * 1024 * 1024,
    )

    if tgt_flat is None:
        logits_pad = pl.pallas_call(
            functools.partial(_bigram_logits_kernel, tile_bt=tile_bt),
            grid_spec=pltpu.PrefetchScalarGridSpec(
                num_scalar_prefetch=1,
                grid=grid,
                in_specs=[pl.BlockSpec(memory_space=pl.ANY)],              # table in HBM
                out_specs=pl.BlockSpec((tile_bt, v_pad), lambda i, idx: (i, 0)),
                scratch_shapes=scratch,
            ),
            out_shape=jax.ShapeDtypeStruct((bt_pad, v_pad), jnp.float32),
            compiler_params=compiler_params,
        )(idx_pad, emb_pad)
        return logits_pad[:bt, :v], None

    tgt_pad = jnp.pad(jnp.clip(tgt_flat.astype(jnp.int32), 0, v - 1),
                      (0, bt_pad - bt)).reshape(bt_pad, 1)

    logits_pad, loss = pl.pallas_call(
        functools.partial(_bigram_loss_kernel, tile_bt=tile_bt, vocab=v, n_rows=bt),
        grid_spec=pltpu.PrefetchScalarGridSpec(
            num_scalar_prefetch=1,
            grid=grid,
            in_specs=[
                pl.BlockSpec((tile_bt, 1), lambda i, idx: (i, 0)),         # targets tile
                pl.BlockSpec(memory_space=pl.ANY),                         # table in HBM
            ],
            out_specs=(
                pl.BlockSpec((tile_bt, v_pad), lambda i, idx: (i, 0)),     # logits tile
                pl.BlockSpec((1, 1), lambda i, idx: (0, 0)),               # resident loss
            ),
            scratch_shapes=scratch,
        ),
        out_shape=(
            jax.ShapeDtypeStruct((bt_pad, v_pad), jnp.float32),
            jax.ShapeDtypeStruct((1, 1), jnp.float32),
        ),
        compiler_params=compiler_params,
    )(idx_pad, tgt_pad, emb_pad)
    return logits_pad[:bt, :v], loss[0, 0]


def bigram_forward(emb, idx, targets=None, *, tile_bt=None):
    """Mirrors BigramLanguageModel.forward.

    idx: (B, T) int token ids.
      targets is None -> (logits (B, T, V), None)
      targets given   -> (logits (B*T, V), scalar mean cross-entropy)
    """
    b, t = idx.shape
    v = emb.shape[0]
    if targets is None:
        logits, _ = _bigram_pallas(idx.reshape(b * t), emb, None, tile_bt=tile_bt)
        return logits.reshape(b, t, v), None
    logits, loss = _bigram_pallas(idx.reshape(b * t), emb,
                                  targets.reshape(b * t), tile_bt=tile_bt)
    return logits, loss


if __name__ == "__main__":
    key = jax.random.PRNGKey(0)
    k_emb, k_idx, k_tgt = jax.random.split(key, 3)

    vocab_size = 32   # small synthetic vocab
    B, T = 2, 8

    # nn.Embedding(vocab_size, vocab_size) ~ N(0, 1) init.
    emb = jax.random.normal(k_emb, (vocab_size, vocab_size), dtype=jnp.float32)
    idx = jax.random.randint(k_idx, (B, T), 0, vocab_size, dtype=jnp.int32)
    targets = jax.random.randint(k_tgt, (B, T), 0, vocab_size, dtype=jnp.int32)

    # Training path: logits flattened to (B*T, V), scalar mean CE loss.
    logits, loss = bigram_forward(emb, idx, targets)
    jax.block_until_ready((logits, loss))

    # Inference path: logits (B, T, V), loss None, no CE math executed.
    logits_nt, loss_nt = bigram_forward(emb, idx, None)
    jax.block_until_ready(logits_nt)

    # Plain-JAX reference.
    ref_logits = emb[idx.reshape(-1)]
    ref_lse = jax.nn.logsumexp(ref_logits, axis=-1)
    ref_picked = jnp.take_along_axis(
        ref_logits, targets.reshape(-1, 1), axis=-1)[:, 0]
    ref_loss = jnp.mean(ref_lse - ref_picked)

    assert logits.shape == (B * T, vocab_size)
    assert logits_nt.shape == (B, T, vocab_size)
    assert loss_nt is None
    assert jnp.allclose(logits, ref_logits, atol=1e-5)
    assert jnp.allclose(logits_nt.reshape(B * T, vocab_size), ref_logits, atol=1e-5)
    assert jnp.allclose(loss, ref_loss, atol=1e-5)

    print("KERNEL_OK")
</pallas_src>

<mosaic_0001>
module attributes {stable_mosaic.version = 11 : i64} {
  func.func @_bigram_loss_kernel(%arg0: i32, %arg1: memref<16xi32, #tpu.memory_space<smem>>, %arg2: memref<8x1xi32, #tpu.memory_space<vmem>>, %arg3: memref<32x128xf32, #tpu.memory_space<any>>, %arg4: memref<8x128xf32, #tpu.memory_space<vmem>>, %arg5: memref<1x1xf32, #tpu.memory_space<vmem>>, %arg6: memref<16x128xf32, #tpu.memory_space<vmem>>, %arg7: memref<2x8x!tpu.dma_semaphore, #tpu.memory_space<semaphore_mem>>) attributes {dimension_semantics = [#tpu.dimension_semantics<arbitrary>], iteration_bounds = array<i64: 2>, scalar_prefetch = 1 : i64, scratch_operands = 2 : i64, tpu.core_type = #tpu.core_type<tc>, window_params = [{transform_indices = @transform_0, window_bounds = array<i64: 8, 1>}, {}, {transform_indices = @transform_2, window_bounds = array<i64: 8, 128>}, {pipeline_mode = #tpu.pipeline_mode<synchronous>, transform_indices = @transform_3, window_bounds = array<i64: 1, 1>}]} {
    %c1_i32 = arith.constant 1 : i32
    %0 = arith.andi %arg0, %c1_i32 : i32
    %c0_i32 = arith.constant 0 : i32
    %1 = arith.cmpi eq, %arg0, %c0_i32 : i32
    %2 = arith.extui %1 : i1 to i32
    %c0_i32_0 = arith.constant 0 : i32
    %3 = arith.cmpi ne, %2, %c0_i32_0 : i32
    scf.if %3 {
      %cst_64 = arith.constant 0.000000e+00 : f32
      %101 = vector.broadcast %cst_64 : f32 to vector<1x1xf32>
      %c0_65 = arith.constant 0 : index
      %c0_66 = arith.constant 0 : index
      %102 = vector.load %arg5[%c0_65, %c0_66] : memref<1x1xf32, #tpu.memory_space<vmem>>, vector<1x1xf32>
      tpu.vector_store %arg5[%c0_65, %c0_66], %101 {strides = array<i32>} : memref<1x1xf32, #tpu.memory_space<vmem>>, vector<1x1xf32>,
      %c0_67 = arith.constant 0 : index
      %103 = memref.load %arg1[%c0_67] : memref<16xi32, #tpu.memory_space<smem>>
      %c0_i32_68 = arith.constant 0 : i32
      %c0_i32_69 = arith.constant 0 : i32
      %c0_i32_70 = arith.constant 0 : i32
      %104 = tpu.memref_slice %arg3[%103, %c0_i32_70] : memref<32x128xf32, #tpu.memory_space<any>> -> memref<1x128xf32, #tpu.memory_space<any>>
      %c0_i32_71 = arith.constant 0 : i32
      %c0_i32_72 = arith.constant 0 : i32
      %105 = tpu.memref_slice %arg6[%c0_i32_71, %c0_i32_72] : memref<16x128xf32, #tpu.memory_space<vmem>> -> memref<1x128xf32, #tpu.memory_space<vmem>>
      %106 = tpu.memref_slice %arg7[%c0_i32_68, %c0_i32_69] : memref<2x8x!tpu.dma_semaphore, #tpu.memory_space<semaphore_mem>> -> memref<1x1x!tpu.dma_semaphore, #tpu.memory_space<semaphore_mem>>
      %107 = tpu.memref_squeeze %106 : memref<1x1x!tpu.dma_semaphore, #tpu.memory_space<semaphore_mem>> -> memref<!tpu.dma_semaphore, #tpu.memory_space<semaphore_mem>>
      tpu.enqueue_dma source(%104 : memref<1x128xf32, #tpu.memory_space<any>>) target(%105 : memref<1x128xf32, #tpu.memory_space<vmem>>) target_semaphore(%107 : memref<!tpu.dma_semaphore, #tpu.memory_space<semaphore_mem>>)
      %c1 = arith.constant 1 : index
      %108 = memref.load %arg1[%c1] : memref<16xi32, #tpu.memory_space<smem>>
      %c0_i32_73 = arith.constant 0 : i32
      %c1_i32_74 = arith.constant 1 : i32
      %c0_i32_75 = arith.constant 0 : i32
      %109 = tpu.memref_slice %arg3[%108, %c0_i32_75] : memref<32x128xf32, #tpu.memory_space<any>> -> memref<1x128xf32, #tpu.memory_space<any>>
      %c1_i32_76 = arith.constant 1 : i32
      %c0_i32_77 = arith.constant 0 : i32
      %110 = tpu.memref_slice %arg6[%c1_i32_76, %c0_i32_77] : memref<16x128xf32, #tpu.memory_space<vmem>> -> memref<1x128xf32, #tpu.memory_space<vmem>>
      %111 = tpu.memref_slice %arg7[%c0_i32_73, %c1_i32_74] : memref<2x8x!tpu.dma_semaphore, #tpu.memory_space<semaphore_mem>> -> memref<1x1x!tpu.dma_semaphore, #tpu.memory_space<semaphore_mem>>
      %112 = tpu.memref_squeeze %111 : memref<1x1x!tpu.dma_semaphore, #tpu.memory_space<semaphore_mem>> -> memref<!tpu.dma_semaphore, #tpu.memory_space<semaphore_mem>>
      tpu.enqueue_dma source(%109 : memref<1x128xf32, #tpu.memory_space<any>>) target(%110 : memref<1x128xf32, #tpu.memory_space<vmem>>) target_semaphore(%112 : memref<!tpu.dma_semaphore, #tpu.memory_space<semaphore_mem>>)
      %c2 = arith.constant 2 : index
      %113 = memref.load %arg1[%c2] : memref<16xi32, #tpu.memory_space<smem>>
      %c0_i32_78 = arith.constant 0 : i32
      %c2_i32_79 = arith.constant 2 : i32
      %c0_i32_80 = arith.constant 0 : i32
      %114 = tpu.memref_slice %arg3[%113, %c0_i32_80] : memref<32x128xf32, #tpu.memory_space<any>> -> memref<1x128xf32, #tpu.memory_space<any>>
      %c2_i32_81 = arith.constant 2 : i32
      %c0_i32_82 = arith.constant 0 : i32
      %115 = tpu.memref_slice %arg6[%c2_i32_81, %c0_i32_82] : memref<16x128xf32, #tpu.memory_space<vmem>> -> memref<1x128xf32, #tpu.memory_space<vmem>>
      %116 = tpu.memref_slice %arg7[%c0_i32_78, %c2_i32_79] : memref<2x8x!tpu.dma_semaphore, #tpu.memory_space<semaphore_mem>> -> memref<1x1x!tpu.dma_semaphore, #tpu.memory_space<semaphore_mem>>
      %117 = tpu.memref_squeeze %116 : memref<1x1x!tpu.dma_semaphore, #tpu.memory_space<semaphore_mem>> -> memref<!tpu.dma_semaphore, #tpu.memory_space<semaphore_mem>>
      tpu.enqueue_dma source(%114 : memref<1x128xf32, #tpu.memory_space<any>>) target(%115 : memref<1x128xf32, #tpu.memory_space<vmem>>) target_semaphore(%117 : memref<!tpu.dma_semaphore, #tpu.memory_space<semaphore_mem>>)
      %c3 = arith.constant 3 : index
      %118 = memref.load %arg1[%c3] : memref<16xi32, #tpu.memory_space<smem>>
      %c0_i32_83 = arith.constant 0 : i32
      %c3_i32_84 = arith.constant 3 : i32
      %c0_i32_85 = arith.constant 0 : i32
      %119 = tpu.memref_slice %arg3[%118, %c0_i32_85] : memref<32x128xf32, #tpu.memory_space<any>> -> memref<1x128xf32, #tpu.memory_space<any>>
      %c3_i32_86 = arith.constant 3 : i32
      %c0_i32_87 = arith.constant 0 : i32
      %120 = tpu.memref_slice %arg6[%c3_i32_86, %c0_i32_87] : memref<16x128xf32, #tpu.memory_space<vmem>> -> memref<1x128xf32, #tpu.memory_space<vmem>>
      %121 = tpu.memref_slice %arg7[%c0_i32_83, %c3_i32_84] : memref<2x8x!tpu.dma_semaphore, #tpu.memory_space<semaphore_mem>> -> memref<1x1x!tpu.dma_semaphore, #tpu.memory_space<semaphore_mem>>
      %122 = tpu.memref_squeeze %121 : memref<1x1x!tpu.dma_semaphore, #tpu.memory_space<semaphore_mem>> -> memref<!tpu.dma_semaphore, #tpu.memory_space<semaphore_mem>>
      tpu.enqueue_dma source(%119 : memref<1x128xf32, #tpu.memory_space<any>>) target(%120 : memref<1x128xf32, #tpu.memory_space<vmem>>) target_semaphore(%122 : memref<!tpu.dma_semaphore, #tpu.memory_space<semaphore_mem>>)
      %c4 = arith.constant 4 : index
      %123 = memref.load %arg1[%c4] : memref<16xi32, #tpu.memory_space<smem>>
      %c0_i32_88 = arith.constant 0 : i32
      %c4_i32_89 = arith.constant 4 : i32
      %c0_i32_90 = arith.constant 0 : i32
      %124 = tpu.memref_slice %arg3[%123, %c0_i32_90] : memref<32x128xf32, #tpu.memory_space<any>> -> memref<1x128xf32, #tpu.memory_space<any>>
      %c4_i32_91 = arith.constant 4 : i32
      %c0_i32_92 = arith.constant 0 : i32
      %125 = tpu.memref_slice %arg6[%c4_i32_91, %c0_i32_92] : memref<16x128xf32, #tpu.memory_space<vmem>> -> memref<1x128xf32, #tpu.memory_space<vmem>>
      %126 = tpu.memref_slice %arg7[%c0_i32_88, %c4_i32_89] : memref<2x8x!tpu.dma_semaphore, #tpu.memory_space<semaphore_mem>> -> memref<1x1x!tpu.dma_semaphore, #tpu.memory_space<semaphore_mem>>
      %127 = tpu.memref_squeeze %126 : memref<1x1x!tpu.dma_semaphore, #tpu.memory_space<semaphore_mem>> -> memref<!tpu.dma_semaphore, #tpu.memory_space<semaphore_mem>>
      tpu.enqueue_dma source(%124 : memref<1x128xf32, #tpu.memory_space<any>>) target(%125 : memref<1x128xf32, #tpu.memory_space<vmem>>) target_semaphore(%127 : memref<!tpu.dma_semaphore, #tpu.memory_space<semaphore_mem>>)
      %c5 = arith.constant 5 : index
      %128 = memref.load %arg1[%c5] : memref<16xi32, #tpu.memory_space<smem>>
      %c0_i32_93 = arith.constant 0 : i32
      %c5_i32_94 = arith.constant 5 : i32
      %c0_i32_95 = arith.constant 0 : i32
      %129 = tpu.memref_slice %arg3[%128, %c0_i32_95] : memref<32x128xf32, #tpu.memory_space<any>> -> memref<1x128xf32, #tpu.memory_space<any>>
      %c5_i32_96 = arith.constant 5 : i32
      %c0_i32_97 = arith.constant 0 : i32
      %130 = tpu.memref_slice %arg6[%c5_i32_96, %c0_i32_97] : memref<16x128xf32, #tpu.memory_space<vmem>> -> memref<1x128xf32, #tpu.memory_space<vmem>>
      %131 = tpu.memref_slice %arg7[%c0_i32_93, %c5_i32_94] : memref<2x8x!tpu.dma_semaphore, #tpu.memory_space<semaphore_mem>> -> memref<1x1x!tpu.dma_semaphore, #tpu.memory_space<semaphore_mem>>
      %132 = tpu.memref_squeeze %131 : memref<1x1x!tpu.dma_semaphore, #tpu.memory_space<semaphore_mem>> -> memref<!tpu.dma_semaphore, #tpu.memory_space<semaphore_mem>>
      tpu.enqueue_dma source(%129 : memref<1x128xf32, #tpu.memory_space<any>>) target(%130 : memref<1x128xf32, #tpu.memory_space<vmem>>) target_semaphore(%132 : memref<!tpu.dma_semaphore, #tpu.memory_space<semaphore_mem>>)
      %c6 = arith.constant 6 : index
      %133 = memref.load %arg1[%c6] : memref<16xi32, #tpu.memory_space<smem>>
      %c0_i32_98 = arith.constant 0 : i32
      %c6_i32_99 = arith.constant 6 : i32
      %c0_i32_100 = arith.constant 0 : i32
      %134 = tpu.memref_slice %arg3[%133, %c0_i32_100] : memref<32x128xf32, #tpu.memory_space<any>> -> memref<1x128xf32, #tpu.memory_space<any>>
      %c6_i32_101 = arith.constant 6 : i32
      %c0_i32_102 = arith.constant 0 : i32
      %135 = tpu.memref_slice %arg6[%c6_i32_101, %c0_i32_102] : memref<16x128xf32, #tpu.memory_space<vmem>> -> memref<1x128xf32, #tpu.memory_space<vmem>>
      %136 = tpu.memref_slice %arg7[%c0_i32_98, %c6_i32_99] : memref<2x8x!tpu.dma_semaphore, #tpu.memory_space<semaphore_mem>> -> memref<1x1x!tpu.dma_semaphore, #tpu.memory_space<semaphore_mem>>
      %137 = tpu.memref_squeeze %136 : memref<1x1x!tpu.dma_semaphore, #tpu.memory_space<semaphore_mem>> -> memref<!tpu.dma_semaphore, #tpu.memory_space<semaphore_mem>>
      tpu.enqueue_dma source(%134 : memref<1x128xf32, #tpu.memory_space<any>>) target(%135 : memref<1x128xf32, #tpu.memory_space<vmem>>) target_semaphore(%137 : memref<!tpu.dma_semaphore, #tpu.memory_space<semaphore_mem>>)
      %c7 = arith.constant 7 : index
      %138 = memref.load %arg1[%c7] : memref<16xi32, #tpu.memory_space<smem>>
      %c0_i32_103 = arith.constant 0 : i32
      %c7_i32_104 = arith.constant 7 : i32
      %c0_i32_105 = arith.constant 0 : i32
      %139 = tpu.memref_slice %arg3[%138, %c0_i32_105] : memref<32x128xf32, #tpu.memory_space<any>> -> memref<1x128xf32, #tpu.memory_space<any>>
      %c7_i32_106 = arith.constant 7 : i32
      %c0_i32_107 = arith.constant 0 : i32
      %140 = tpu.memref_slice %arg6[%c7_i32_106, %c0_i32_107] : memref<16x128xf32, #tpu.memory_space<vmem>> -> memref<1x128xf32, #tpu.memory_space<vmem>>
      %141 = tpu.memref_slice %arg7[%c0_i32_103, %c7_i32_104] : memref<2x8x!tpu.dma_semaphore, #tpu.memory_space<semaphore_mem>> -> memref<1x1x!tpu.dma_semaphore, #tpu.memory_space<semaphore_mem>>
      %142 = tpu.memref_squeeze %141 : memref<1x1x!tpu.dma_semaphore, #tpu.memory_space<semaphore_mem>> -> memref<!tpu.dma_semaphore, #tpu.memory_space<semaphore_mem>>
      tpu.enqueue_dma source(%139 : memref<1x128xf32, #tpu.memory_space<any>>) target(%140 : memref<1x128xf32, #tpu.memory_space<vmem>>) target_semaphore(%142 : memref<!tpu.dma_semaphore, #tpu.memory_space<semaphore_mem>>)
    } else {
    }
    %c8_i32 = arith.constant 8 : i32
    %4 = arith.muli %0, %c8_i32 : i32
    %c0_i32_1 = arith.constant 0 : i32
    %5 = arith.addi %4, %c0_i32_1 : i32
    %c0_i32_2 = arith.constant 0 : i32
    %c0_i32_3 = arith.constant 0 : i32
    %c0_i32_4 = arith.constant 0 : i32
    %6 = tpu.memref_slice %arg3[%c0_i32_3, %c0_i32_4] : memref<32x128xf32, #tpu.memory_space<any>> -> memref<1x128xf32, #tpu.memory_space<any>>
    %c0_i32_5 = arith.constant 0 : i32
    %7 = tpu.memref_slice %arg6[%5, %c0_i32_5] : memref<16x128xf32, #tpu.memory_space<vmem>> -> memref<1x128xf32, #tpu.memory_space<vmem>>
    %8 = tpu.memref_slice %arg7[%0, %c0_i32_2] : memref<2x8x!tpu.dma_semaphore, #tpu.memory_space<semaphore_mem>> -> memref<1x1x!tpu.dma_semaphore, #tpu.memory_space<semaphore_mem>>
    %9 = tpu.memref_squeeze %8 : memref<1x1x!tpu.dma_semaphore, #tpu.memory_space<semaphore_mem>> -> memref<!tpu.dma_semaphore, #tpu.memory_space<semaphore_mem>>
    tpu.wait_dma2 semaphore(%9 : memref<!tpu.dma_semaphore, #tpu.memory_space<semaphore_mem>>) src(%6 : memref<1x128xf32, #tpu.memory_space<any>>) dst(%7 : memref<1x128xf32, #tpu.memory_space<vmem>>)
    %c8_i32_6 = arith.constant 8 : i32
    %10 = arith.muli %0, %c8_i32_6 : i32
    %c1_i32_7 = arith.constant 1 : i32
    %11 = arith.addi %10, %c1_i32_7 : i32
    %c1_i32_8 = arith.constant 1 : i32
    %c0_i32_9 = arith.constant 0 : i32
    %c0_i32_10 = arith.constant 0 : i32
    %12 = tpu.memref_slice %arg3[%c0_i32_9, %c0_i32_10] : memref<32x128xf32, #tpu.memory_space<any>> -> memref<1x128xf32, #tpu.memory_space<any>>
    %c0_i32_11 = arith.constant 0 : i32
    %13 = tpu.memref_slice %arg6[%11, %c0_i32_11] : memref<16x128xf32, #tpu.memory_space<vmem>> -> memref<1x128xf32, #tpu.memory_space<vmem>>
    %14 = tpu.memref_slice %arg7[%0, %c1_i32_8] : memref<2x8x!tpu.dma_semaphore, #tpu.memory_space<semaphore_mem>> -> memref<1x1x!tpu.dma_semaphore, #tpu.memory_space<semaphore_mem>>
    %15 = tpu.memref_squeeze %14 : memref<1x1x!tpu.dma_semaphore, #tpu.memory_space<semaphore_mem>> -> memref<!tpu.dma_semaphore, #tpu.memory_space<semaphore_mem>>
    tpu.wait_dma2 semaphore(%15 : memref<!tpu.dma_semaphore, #tpu.memory_space<semaphore_mem>>) src(%12 : memref<1x128xf32, #tpu.memory_space<any>>) dst(%13 : memref<1x128xf32, #tpu.memory_space<vmem>>)
    %c8_i32_12 = arith.constant 8 : i32
    %16 = arith.muli %0, %c8_i32_12 : i32
    %c2_i32 = arith.constant 2 : i32
    %17 = arith.addi %16, %c2_i32 : i32
    %c2_i32_13 = arith.constant 2 : i32
    %c0_i32_14 = arith.constant 0 : i32
    %c0_i32_15 = arith.constant 0 : i32
    %18 = tpu.memref_slice %arg3[%c0_i32_14, %c0_i32_15] : memref<32x128xf32, #tpu.memory_space<any>> -> memref<1x128xf32, #tpu.memory_space<any>>
    %c0_i32_16 = arith.constant 0 : i32
    %19 = tpu.memref_slice %arg6[%17, %c0_i32_16] : memref<16x128xf32, #tpu.memory_space<vmem>> -> memref<1x128xf32, #tpu.memory_space<vmem>>
    %20 = tpu.memref_slice %arg7[%0, %c2_i32_13] : memref<2x8x!tpu.dma_semaphore, #tpu.memory_space<semaphore_mem>> -> memref<1x1x!tpu.dma_semaphore, #tpu.memory_space<semaphore_mem>>
    %21 = tpu.memref_squeeze %20 : memref<1x1x!tpu.dma_semaphore, #tpu.memory_space<semaphore_mem>> -> memref<!tpu.dma_semaphore, #tpu.memory_space<semaphore_mem>>
    tpu.wait_dma2 semaphore(%21 : memref<!tpu.dma_semaphore, #tpu.memory_space<semaphore_mem>>) src(%18 : memref<1x128xf32, #tpu.memory_space<any>>) dst(%19 : memref<1x128xf32, #tpu.memory_space<vmem>>)
    %c8_i32_17 = arith.constant 8 : i32
    %22 = arith.muli %0, %c8_i32_17 : i32
    %c3_i32 = arith.constant 3 : i32
    %23 = arith.addi %22, %c3_i32 : i32
    %c3_i32_18 = arith.constant 3 : i32
    %c0_i32_19 = arith.constant 0 : i32
    %c0_i32_20 = arith.constant 0 : i32
    %24 = tpu.memref_slice %arg3[%c0_i32_19, %c0_i32_20] : memref<32x128xf32, #tpu.memory_space<any>> -> memref<1x128xf32, #tpu.memory_space<any>>
    %c0_i32_21 = arith.constant 0 : i32
    %25 = tpu.memref_slice %arg6[%23, %c0_i32_21] : memref<16x128xf32, #tpu.memory_space<vmem>> -> memref<1x128xf32, #tpu.memory_space<vmem>>
    %26 = tpu.memref_slice %arg7[%0, %c3_i32_18] : memref<2x8x!tpu.dma_semaphore, #tpu.memory_space<semaphore_mem>> -> memref<1x1x!tpu.dma_semaphore, #tpu.memory_space<semaphore_mem>>
    %27 = tpu.memref_squeeze %26 : memref<1x1x!tpu.dma_semaphore, #tpu.memory_space<semaphore_mem>> -> memref<!tpu.dma_semaphore, #tpu.memory_space<semaphore_mem>>
    tpu.wait_dma2 semaphore(%27 : memref<!tpu.dma_semaphore, #tpu.memory_space<semaphore_mem>>) src(%24 : memref<1x128xf32, #tpu.memory_space<any>>) dst(%25 : memref<1x128xf32, #tpu.memory_space<vmem>>)
    %c8_i32_22 = arith.constant 8 : i32
    %28 = arith.muli %0, %c8_i32_22 : i32
    %c4_i32 = arith.constant 4 : i32
    %29 = arith.addi %28, %c4_i32 : i32
    %c4_i32_23 = arith.constant 4 : i32
    %c0_i32_24 = arith.constant 0 : i32
    %c0_i32_25 = arith.constant 0 : i32
    %30 = tpu.memref_slice %arg3[%c0_i32_24, %c0_i32_25] : memref<32x128xf32, #tpu.memory_space<any>> -> memref<1x128xf32, #tpu.memory_space<any>>
    %c0_i32_26 = arith.constant 0 : i32
    %31 = tpu.memref_slice %arg6[%29, %c0_i32_26] : memref<16x128xf32, #tpu.memory_space<vmem>> -> memref<1x128xf32, #tpu.memory_space<vmem>>
    %32 = tpu.memref_slice %arg7[%0, %c4_i32_23] : memref<2x8x!tpu.dma_semaphore, #tpu.memory_space<semaphore_mem>> -> memref<1x1x!tpu.dma_semaphore, #tpu.memory_space<semaphore_mem>>
    %33 = tpu.memref_squeeze %32 : memref<1x1x!tpu.dma_semaphore, #tpu.memory_space<semaphore_mem>> -> memref<!tpu.dma_semaphore, #tpu.memory_space<semaphore_mem>>
    tpu.wait_dma2 semaphore(%33 : memref<!tpu.dma_semaphore, #tpu.memory_space<semaphore_mem>>) src(%30 : memref<1x128xf32, #tpu.memory_space<any>>) dst(%31 : memref<1x128xf32, #tpu.memory_space<vmem>>)
    %c8_i32_27 = arith.constant 8 : i32
    %34 = arith.muli %0, %c8_i32_27 : i32
    %c5_i32 = arith.constant 5 : i32
    %35 = arith.addi %34, %c5_i32 : i32
    %c5_i32_28 = arith.constant 5 : i32
    %c0_i32_29 = arith.constant 0 : i32
    %c0_i32_30 = arith.constant 0 : i32
    %36 = tpu.memref_slice %arg3[%c0_i32_29, %c0_i32_30] : memref<32x128xf32, #tpu.memory_space<any>> -> memref<1x128xf32, #tpu.memory_space<any>>
    %c0_i32_31 = arith.constant 0 : i32
    %37 = tpu.memref_slice %arg6[%35, %c0_i32_31] : memref<16x128xf32, #tpu.memory_space<vmem>> -> memref<1x128xf32, #tpu.memory_space<vmem>>
    %38 = tpu.memref_slice %arg7[%0, %c5_i32_28] : memref<2x8x!tpu.dma_semaphore, #tpu.memory_space<semaphore_mem>> -> memref<1x1x!tpu.dma_semaphore, #tpu.memory_space<semaphore_mem>>
    %39 = tpu.memref_squeeze %38 : memref<1x1x!tpu.dma_semaphore, #tpu.memory_space<semaphore_mem>> -> memref<!tpu.dma_semaphore, #tpu.memory_space<semaphore_mem>>
    tpu.wait_dma2 semaphore(%39 : memref<!tpu.dma_semaphore, #tpu.memory_space<semaphore_mem>>) src(%36 : memref<1x128xf32, #tpu.memory_space<any>>) dst(%37 : memref<1x128xf32, #tpu.memory_space<vmem>>)
    %c8_i32_32 = arith.constant 8 : i32
    %40 = arith.muli %0, %c8_i32_32 : i32
    %c6_i32 = arith.constant 6 : i32
    %41 = arith.addi %40, %c6_i32 : i32
    %c6_i32_33 = arith.constant 6 : i32
    %c0_i32_34 = arith.constant 0 : i32
    %c0_i32_35 = arith.constant 0 : i32
    %42 = tpu.memref_slice %arg3[%c0_i32_34, %c0_i32_35] : memref<32x128xf32, #tpu.memory_space<any>> -> memref<1x128xf32, #tpu.memory_space<any>>
    %c0_i32_36 = arith.constant 0 : i32
    %43 = tpu.memref_slice %arg6[%41, %c0_i32_36] : memref<16x128xf32, #tpu.memory_space<vmem>> -> memref<1x128xf32, #tpu.memory_space<vmem>>
    %44 = tpu.memref_slice %arg7[%0, %c6_i32_33] : memref<2x8x!tpu.dma_semaphore, #tpu.memory_space<semaphore_mem>> -> memref<1x1x!tpu.dma_semaphore, #tpu.memory_space<semaphore_mem>>
    %45 = tpu.memref_squeeze %44 : memref<1x1x!tpu.dma_semaphore, #tpu.memory_space<semaphore_mem>> -> memref<!tpu.dma_semaphore, #tpu.memory_space<semaphore_mem>>
    tpu.wait_dma2 semaphore(%45 : memref<!tpu.dma_semaphore, #tpu.memory_space<semaphore_mem>>) src(%42 : memref<1x128xf32, #tpu.memory_space<any>>) dst(%43 : memref<1x128xf32, #tpu.memory_space<vmem>>)
    %c8_i32_37 = arith.constant 8 : i32
    %46 = arith.muli %0, %c8_i32_37 : i32
    %c7_i32 = arith.constant 7 : i32
    %47 = arith.addi %46, %c7_i32 : i32
    %c7_i32_38 = arith.constant 7 : i32
    %c0_i32_39 = arith.constant 0 : i32
    %c0_i32_40 = arith.constant 0 : i32
    %48 = tpu.memref_slice %arg3[%c0_i32_39, %c0_i32_40] : memref<32x128xf32, #tpu.memory_space<any>> -> memref<1x128xf32, #tpu.memory_space<any>>
    %c0_i32_41 = arith.constant 0 : i32
    %49 = tpu.memref_slice %arg6[%47, %c0_i32_41] : memref<16x128xf32, #tpu.memory_space<vmem>> -> memref<1x128xf32, #tpu.memory_space<vmem>>
    %50 = tpu.memref_slice %arg7[%0, %c7_i32_38] : memref<2x8x!tpu.dma_semaphore, #tpu.memory_space<semaphore_mem>> -> memref<1x1x!tpu.dma_semaphore, #tpu.memory_space<semaphore_mem>>
    %51 = tpu.memref_squeeze %50 : memref<1x1x!tpu.dma_semaphore, #tpu.memory_space<semaphore_mem>> -> memref<!tpu.dma_semaphore, #tpu.memory_space<semaphore_mem>>
    tpu.wait_dma2 semaphore(%51 : memref<!tpu.dma_semaphore, #tpu.memory_space<semaphore_mem>>) src(%48 : memref<1x128xf32, #tpu.memory_space<any>>) dst(%49 : memref<1x128xf32, #tpu.memory_space<vmem>>)
    %c1_i32_42 = arith.constant 1 : i32
    %52 = arith.addi %arg0, %c1_i32_42 : i32
    %c2_i32_43 = arith.constant 2 : i32
    %53 = arith.cmpi slt, %52, %c2_i32_43 : i32
    %54 = arith.extui %53 : i1 to i32
    %c0_i32_44 = arith.constant 0 : i32
    %55 = arith.cmpi ne, %54, %c0_i32_44 : i32
    scf.if %55 {
      %c1_i32_64 = arith.constant 1 : i32
      %101 = arith.addi %arg0, %c1_i32_64 : i32
      %c1_i32_65 = arith.constant 1 : i32
      %102 = arith.subi %c1_i32_65, %0 : i32
      %c8_i32_66 = arith.constant 8 : i32
      %103 = arith.muli %101, %c8_i32_66 : i32
      %c0_i32_67 = arith.constant 0 : i32
      %104 = arith.addi %103, %c0_i32_67 : i32
      %105 = arith.index_cast %104 : i32 to index
      %106 = memref.load %arg1[%105] : memref<16xi32, #tpu.memory_space<smem>>
      %c8_i32_68 = arith.constant 8 : i32
      %107 = arith.muli %102, %c8_i32_68 : i32
      %c0_i32_69 = arith.constant 0 : i32
      %108 = arith.addi %107, %c0_i32_69 : i32
      %c0_i32_70 = arith.constant 0 : i32
      %c0_i32_71 = arith.constant 0 : i32
      %109 = tpu.memref_slice %arg3[%106, %c0_i32_71] : memref<32x128xf32, #tpu.memory_space<any>> -> memref<1x128xf32, #tpu.memory_space<any>>
      %c0_i32_72 = arith.constant 0 : i32
      %110 = tpu.memref_slice %arg6[%108, %c0_i32_72] : memref<16x128xf32, #tpu.memory_space<vmem>> -> memref<1x128xf32, #tpu.memory_space<vmem>>
      %111 = tpu.memref_slice %arg7[%102, %c0_i32_70] : memref<2x8x!tpu.dma_semaphore, #tpu.memory_space<semaphore_mem>> -> memref<1x1x!tpu.dma_semaphore, #tpu.memory_space<semaphore_mem>>
      %112 = tpu.memref_squeeze %111 : memref<1x1x!tpu.dma_semaphore, #tpu.memory_space<semaphore_mem>> -> memref<!tpu.dma_semaphore, #tpu.memory_space<semaphore_mem>>
      tpu.enqueue_dma source(%109 : memref<1x128xf32, #tpu.memory_space<any>>) target(%110 : memref<1x128xf32, #tpu.memory_space<vmem>>) target_semaphore(%112 : memref<!tpu.dma_semaphore, #tpu.memory_space<semaphore_mem>>)
      %c1_i32_73 = arith.constant 1 : i32
      %113 = arith.addi %103, %c1_i32_73 : i32
      %114 = arith.index_cast %113 : i32 to index
      %115 = memref.load %arg1[%114] : memref<16xi32, #tpu.memory_space<smem>>
      %c8_i32_74 = arith.constant 8 : i32
      %116 = arith.muli %102, %c8_i32_74 : i32
      %c1_i32_75 = arith.constant 1 : i32
      %117 = arith.addi %116, %c1_i32_75 : i32
      %c1_i32_76 = arith.constant 1 : i32
      %c0_i32_77 = arith.constant 0 : i32
      %118 = tpu.memref_slice %arg3[%115, %c0_i32_77] : memref<32x128xf32, #tpu.memory_space<any>> -> memref<1x128xf32, #tpu.memory_space<any>>
      %c0_i32_78 = arith.constant 0 : i32
      %119 = tpu.memref_slice %arg6[%117, %c0_i32_78] : memref<16x128xf32, #tpu.memory_space<vmem>> -> memref<1x128xf32, #tpu.memory_space<vmem>>
      %120 = tpu.memref_slice %arg7[%102, %c1_i32_76] : memref<2x8x!tpu.dma_semaphore, #tpu.memory_space<semaphore_mem>> -> memref<1x1x!tpu.dma_semaphore, #tpu.memory_space<semaphore_mem>>
      %121 = tpu.memref_squeeze %120 : memref<1x1x!tpu.dma_semaphore, #tpu.memory_space<semaphore_mem>> -> memref<!tpu.dma_semaphore, #tpu.memory_space<semaphore_mem>>
      tpu.enqueue_dma source(%118 : memref<1x128xf32, #tpu.memory_space<any>>) target(%119 : memref<1x128xf32, #tpu.memory_space<vmem>>) target_semaphore(%121 : memref<!tpu.dma_semaphore, #tpu.memory_space<semaphore_mem>>)
      %c2_i32_79 = arith.constant 2 : i32
      %122 = arith.addi %103, %c2_i32_79 : i32
      %123 = arith.index_cast %122 : i32 to index
      %124 = memref.load %arg1[%123] : memref<16xi32, #tpu.memory_space<smem>>
      %c8_i32_80 = arith.constant 8 : i32
      %125 = arith.muli %102, %c8_i32_80 : i32
      %c2_i32_81 = arith.constant 2 : i32
      %126 = arith.addi %125, %c2_i32_81 : i32
      %c2_i32_82 = arith.constant 2 : i32
      %c0_i32_83 = arith.constant 0 : i32
      %127 = tpu.memref_slice %arg3[%124, %c0_i32_83] : memref<32x128xf32, #tpu.memory_space<any>> -> memref<1x128xf32, #tpu.memory_space<any>>
      %c0_i32_84 = arith.constant 0 : i32
      %128 = tpu.memref_slice %arg6[%126, %c0_i32_84] : memref<16x128xf32, #tpu.memory_space<vmem>> -> memref<1x128xf32, #tpu.memory_space<vmem>>
      %129 = tpu.memref_slice %arg7[%102, %c2_i32_82] : memref<2x8x!tpu.dma_semaphore, #tpu.memory_space<semaphore_mem>> -> memref<1x1x!tpu.dma_semaphore, #tpu.memory_space<semaphore_mem>>
      %130 = tpu.memref_squeeze %129 : memref<1x1x!tpu.dma_semaphore, #tpu.memory_space<semaphore_mem>> -> memref<!tpu.dma_semaphore, #tpu.memory_space<semaphore_mem>>
      tpu.enqueue_dma source(%127 : memref<1x128xf32, #tpu.memory_space<any>>) target(%128 : memref<1x128xf32, #tpu.memory_space<vmem>>) target_semaphore(%130 : memref<!tpu.dma_semaphore, #tpu.memory_space<semaphore_mem>>)
      %c3_i32_85 = arith.constant 3 : i32
      %131 = arith.addi %103, %c3_i32_85 : i32
      %132 = arith.index_cast %131 : i32 to index
      %133 = memref.load %arg1[%132] : memref<16xi32, #tpu.memory_space<smem>>
      %c8_i32_86 = arith.constant 8 : i32
      %134 = arith.muli %102, %c8_i32_86 : i32
      %c3_i32_87 = arith.constant 3 : i32
      %135 = arith.addi %134, %c3_i32_87 : i32
      %c3_i32_88 = arith.constant 3 : i32
      %c0_i32_89 = arith.constant 0 : i32
      %136 = tpu.memref_slice %arg3[%133, %c0_i32_89] : memref<32x128xf32, #tpu.memory_space<any>> -> memref<1x128xf32, #tpu.memory_space<any>>
      %c0_i32_90 = arith.constant 0 : i32
      %137 = tpu.memref_slice %arg6[%135, %c0_i32_90] : memref<16x128xf32, #tpu.memory_space<vmem>> -> memref<1x128xf32, #tpu.memory_space<vmem>>
      %138 = tpu.memref_slice %arg7[%102, %c3_i32_88] : memref<2x8x!tpu.dma_semaphore, #tpu.memory_space<semaphore_mem>> -> memref<1x1x!tpu.dma_semaphore, #tpu.memory_space<semaphore_mem>>
      %139 = tpu.memref_squeeze %138 : memref<1x1x!tpu.dma_semaphore, #tpu.memory_space<semaphore_mem>> -> memref<!tpu.dma_semaphore, #tpu.memory_space<semaphore_mem>>
      tpu.enqueue_dma source(%136 : memref<1x128xf32, #tpu.memory_space<any>>) target(%137 : memref<1x128xf32, #tpu.memory_space<vmem>>) target_semaphore(%139 : memref<!tpu.dma_semaphore, #tpu.memory_space<semaphore_mem>>)
      %c4_i32_91 = arith.constant 4 : i32
      %140 = arith.addi %103, %c4_i32_91 : i32
      %141 = arith.index_cast %140 : i32 to index
      %142 = memref.load %arg1[%141] : memref<16xi32, #tpu.memory_space<smem>>
      %c8_i32_92 = arith.constant 8 : i32
      %143 = arith.muli %102, %c8_i32_92 : i32
      %c4_i32_93 = arith.constant 4 : i32
      %144 = arith.addi %143, %c4_i32_93 : i32
      %c4_i32_94 = arith.constant 4 : i32
      %c0_i32_95 = arith.constant 0 : i32
      %145 = tpu.memref_slice %arg3[%142, %c0_i32_95] : memref<32x128xf32, #tpu.memory_space<any>> -> memref<1x128xf32, #tpu.memory_space<any>>
      %c0_i32_96 = arith.constant 0 : i32
      %146 = tpu.memref_slice %arg6[%144, %c0_i32_96] : memref<16x128xf32, #tpu.memory_space<vmem>> -> memref<1x128xf32, #tpu.memory_space<vmem>>
      %147 = tpu.memref_slice %arg7[%102, %c4_i32_94] : memref<2x8x!tpu.dma_semaphore, #tpu.memory_space<semaphore_mem>> -> memref<1x1x!tpu.dma_semaphore, #tpu.memory_space<semaphore_mem>>
      %148 = tpu.memref_squeeze %147 : memref<1x1x!tpu.dma_semaphore, #tpu.memory_space<semaphore_mem>> -> memref<!tpu.dma_semaphore, #tpu.memory_space<semaphore_mem>>
      tpu.enqueue_dma source(%145 : memref<1x128xf32, #tpu.memory_space<any>>) target(%146 : memref<1x128xf32, #tpu.memory_space<vmem>>) target_semaphore(%148 : memref<!tpu.dma_semaphore, #tpu.memory_space<semaphore_mem>>)
      %c5_i32_97 = arith.constant 5 : i32
      %149 = arith.addi %103, %c5_i32_97 : i32
      %150 = arith.index_cast %149 : i32 to index
      %151 = memref.load %arg1[%150] : memref<16xi32, #tpu.memory_space<smem>>
      %c8_i32_98 = arith.constant 8 : i32
      %152 = arith.muli %102, %c8_i32_98 : i32
      %c5_i32_99 = arith.constant 5 : i32
      %153 = arith.addi %152, %c5_i32_99 : i32
      %c5_i32_100 = arith.constant 5 : i32
      %c0_i32_101 = arith.constant 0 : i32
      %154 = tpu.memref_slice %arg3[%151, %c0_i32_101] : memref<32x128xf32, #tpu.memory_space<any>> -> memref<1x128xf32, #tpu.memory_space<any>>
      %c0_i32_102 = arith.constant 0 : i32
      %155 = tpu.memref_slice %arg6[%153, %c0_i32_102] : memref<16x128xf32, #tpu.memory_space<vmem>> -> memref<1x128xf32, #tpu.memory_space<vmem>>
      %156 = tpu.memref_slice %arg7[%102, %c5_i32_100] : memref<2x8x!tpu.dma_semaphore, #tpu.memory_space<semaphore_mem>> -> memref<1x1x!tpu.dma_semaphore, #tpu.memory_space<semaphore_mem>>
      %157 = tpu.memref_squeeze %156 : memref<1x1x!tpu.dma_semaphore, #tpu.memory_space<semaphore_mem>> -> memref<!tpu.dma_semaphore, #tpu.memory_space<semaphore_mem>>
      tpu.enqueue_dma source(%154 : memref<1x128xf32, #tpu.memory_space<any>>) target(%155 : memref<1x128xf32, #tpu.memory_space<vmem>>) target_semaphore(%157 : memref<!tpu.dma_semaphore, #tpu.memory_space<semaphore_mem>>)
      %c6_i32_103 = arith.constant 6 : i32
      %158 = arith.addi %103, %c6_i32_103 : i32
      %159 = arith.index_cast %158 : i32 to index
      %160 = memref.load %arg1[%159] : memref<16xi32, #tpu.memory_space<smem>>
      %c8_i32_104 = arith.constant 8 : i32
      %161 = arith.muli %102, %c8_i32_104 : i32
      %c6_i32_105 = arith.constant 6 : i32
      %162 = arith.addi %161, %c6_i32_105 : i32
      %c6_i32_106 = arith.constant 6 : i32
      %c0_i32_107 = arith.constant 0 : i32
      %163 = tpu.memref_slice %arg3[%160, %c0_i32_107] : memref<32x128xf32, #tpu.memory_space<any>> -> memref<1x128xf32, #tpu.memory_space<any>>
      %c0_i32_108 = arith.constant 0 : i32
      %164 = tpu.memref_slice %arg6[%162, %c0_i32_108] : memref<16x128xf32, #tpu.memory_space<vmem>> -> memref<1x128xf32, #tpu.memory_space<vmem>>
      %165 = tpu.memref_slice %arg7[%102, %c6_i32_106] : memref<2x8x!tpu.dma_semaphore, #tpu.memory_space<semaphore_mem>> -> memref<1x1x!tpu.dma_semaphore, #tpu.memory_space<semaphore_mem>>
      %166 = tpu.memref_squeeze %165 : memref<1x1x!tpu.dma_semaphore, #tpu.memory_space<semaphore_mem>> -> memref<!tpu.dma_semaphore, #tpu.memory_space<semaphore_mem>>
      tpu.enqueue_dma source(%163 : memref<1x128xf32, #tpu.memory_space<any>>) target(%164 : memref<1x128xf32, #tpu.memory_space<vmem>>) target_semaphore(%166 : memref<!tpu.dma_semaphore, #tpu.memory_space<semaphore_mem>>)
      %c7_i32_109 = arith.constant 7 : i32
      %167 = arith.addi %103, %c7_i32_109 : i32
      %168 = arith.index_cast %167 : i32 to index
      %169 = memref.load %arg1[%168] : memref<16xi32, #tpu.memory_space<smem>>
      %c8_i32_110 = arith.constant 8 : i32
      %170 = arith.muli %102, %c8_i32_110 : i32
      %c7_i32_111 = arith.constant 7 : i32
      %171 = arith.addi %170, %c7_i32_111 : i32
      %c7_i32_112 = arith.constant 7 : i32
      %c0_i32_113 = arith.constant 0 : i32
      %172 = tpu.memref_slice %arg3[%169, %c0_i32_113] : memref<32x128xf32, #tpu.memory_space<any>> -> memref<1x128xf32, #tpu.memory_space<any>>
      %c0_i32_114 = arith.constant 0 : i32
      %173 = tpu.memref_slice %arg6[%171, %c0_i32_114] : memref<16x128xf32, #tpu.memory_space<vmem>> -> memref<1x128xf32, #tpu.memory_space<vmem>>
      %174 = tpu.memref_slice %arg7[%102, %c7_i32_112] : memref<2x8x!tpu.dma_semaphore, #tpu.memory_space<semaphore_mem>> -> memref<1x1x!tpu.dma_semaphore, #tpu.memory_space<semaphore_mem>>
      %175 = tpu.memref_squeeze %174 : memref<1x1x!tpu.dma_semaphore, #tpu.memory_space<semaphore_mem>> -> memref<!tpu.dma_semaphore, #tpu.memory_space<semaphore_mem>>
      tpu.enqueue_dma source(%172 : memref<1x128xf32, #tpu.memory_space<any>>) target(%173 : memref<1x128xf32, #tpu.memory_space<vmem>>) target_semaphore(%175 : memref<!tpu.dma_semaphore, #tpu.memory_space<semaphore_mem>>)
    } else {
    }
    %c8_i32_45 = arith.constant 8 : i32
    %56 = arith.muli %0, %c8_i32_45 : i32
    %57 = tpu.assume_multiple %56, 8 : i32
    %58 = arith.index_cast %57 : i32 to index
    %c0 = arith.constant 0 : index
    %59 = vector.load %arg6[%58, %c0] : memref<16x128xf32, #tpu.memory_space<vmem>>, vector<8x128xf32>
    %c0_46 = arith.constant 0 : index
    %c0_47 = arith.constant 0 : index
    %60 = vector.load %arg4[%c0_46, %c0_47] : memref<8x128xf32, #tpu.memory_space<vmem>>, vector<8x128xf32>
    tpu.vector_store %arg4[%c0_46, %c0_47], %59 {strides = array<i32>} : memref<8x128xf32, #tpu.memory_space<vmem>>, vector<8x128xf32>,
    %61 = tpu.iota {dimensions = array<i32: 1>} : vector<8x128xi32>
    %c32_i32 = arith.constant 32 : i32
    %62 = vector.broadcast %c32_i32 : i32 to vector<8x128xi32>
    %63 = arith.cmpi slt, %61, %62 : vector<8x128xi32>
    %cst = arith.constant -1.000000e+30 : f32
    %64 = vector.broadcast %cst : f32 to vector<8x128xf32>
    %65 = arith.select %63, %59, %64 : vector<8x128xi1>, vector<8x128xf32>
    %cst_48 = arith.constant dense<0xFF800000> : vector<8xf32>
    %66 = vector.multi_reduction <maximumf>, %65, %cst_48 [1] : vector<8x128xf32> to vector<8xf32>
    %67 = vector.shape_cast %66 : vector<8xf32> to vector<8x1xf32>
    %68 = vector.broadcast %67 : vector<8x1xf32> to vector<8x128xf32>
    %69 = arith.subf %65, %68 : vector<8x128xf32>
    %70 = math.exp %69 : vector<8x128xf32>
    %cst_49 = arith.constant 0.000000e+00 : f32
    %71 = vector.broadcast %cst_49 : f32 to vector<8x128xf32>
    %72 = arith.select %63, %70, %71 : vector<8x128xi1>, vector<8x128xf32>
    %cst_50 = arith.constant dense<0.000000e+00> : vector<8xf32>
    %73 = vector.multi_reduction <add>, %72, %cst_50 [1] : vector<8x128xf32> to vector<8xf32>
    %74 = vector.shape_cast %73 : vector<8xf32> to vector<8x1xf32>
    %75 = math.log %74 : vector<8x1xf32>
    %76 = arith.addf %67, %75 : vector<8x1xf32>
    %c0_51 = arith.constant 0 : index
    %c0_52 = arith.constant 0 : index
    %77 = vector.load %arg2[%c0_51, %c0_52] : memref<8x1xi32, #tpu.memory_space<vmem>>, vector<8x1xi32>
    %78 = vector.broadcast %77 : vector<8x1xi32> to vector<8x128xi32>
    %79 = arith.cmpi eq, %61, %78 : vector<8x128xi32>
    %cst_53 = arith.constant 0.000000e+00 : f32
    %80 = vector.broadcast %cst_53 : f32 to vector<8x128xf32>
    %81 = arith.select %79, %59, %80 : vector<8x128xi1>, vector<8x128xf32>
    %cst_54 = arith.constant dense<0.000000e+00> : vector<8xf32>
    %82 = vector.multi_reduction <add>, %81, %cst_54 [1] : vector<8x128xf32> to vector<8xf32>
    %83 = vector.shape_cast %82 : vector<8xf32> to vector<8x1xf32>
    %c8_i32_55 = arith.constant 8 : i32
    %84 = arith.muli %arg0, %c8_i32_55 : i32
    %85 = tpu.iota {dimensions = array<i32: 0>} : vector<8x1xi32>
    %86 = vector.broadcast %84 : i32 to vector<8x1xi32>
    %87 = arith.addi %86, %85 : vector<8x1xi32>
    %c16_i32 = arith.constant 16 : i32
    %88 = vector.broadcast %c16_i32 : i32 to vector<8x1xi32>
    %89 = arith.cmpi slt, %87, %88 : vector<8x1xi32>
    %90 = arith.subf %76, %83 : vector<8x1xf32>
    %cst_56 = arith.constant 0.000000e+00 : f32
    %91 = vector.broadcast %cst_56 : f32 to vector<8x1xf32>
    %92 = arith.select %89, %90, %91 : vector<8x1xi1>, vector<8x1xf32>
    %c0_57 = arith.constant 0 : index
    %c0_58 = arith.constant 0 : index
    %93 = vector.load %arg5[%c0_57, %c0_58] : memref<1x1xf32, #tpu.memory_space<vmem>>, vector<1x1xf32>
    %cst_59 = arith.constant dense<0.000000e+00> : vector<1xf32>
    %94 = vector.multi_reduction <add>, %92, %cst_59 [0] : vector<8x1xf32> to vector<1xf32>
    %95 = vector.shape_cast %94 : vector<1xf32> to vector<1x1xf32>
    %96 = arith.addf %93, %95 : vector<1x1xf32>
    %c0_60 = arith.constant 0 : index
    %c0_61 = arith.constant 0 : index
    %97 = vector.load %arg5[%c0_60, %c0_61] : memref<1x1xf32, #tpu.memory_space<vmem>>, vector<1x1xf32>
    tpu.vector_store %arg5[%c0_60, %c0_61], %96 {strides = array<i32>} : memref<1x1xf32, #tpu.memory_space<vmem>>, vector<1x1xf32>,
    %c1_i32_62 = arith.constant 1 : i32
    %98 = arith.cmpi eq, %arg0, %c1_i32_62 : i32
    %99 = arith.extui %98 : i1 to i32
    %c0_i32_63 = arith.constant 0 : i32
    %100 = arith.cmpi ne, %99, %c0_i32_63 : i32
    scf.if %100 {
      %c0_64 = arith.constant 0 : index
      %c0_65 = arith.constant 0 : index
      %101 = vector.load %arg5[%c0_64, %c0_65] : memref<1x1xf32, #tpu.memory_space<vmem>>, vector<1x1xf32>
      %cst_66 = arith.constant 6.250000e-02 : f32
      %102 = vector.broadcast %cst_66 : f32 to vector<1x1xf32>
      %103 = arith.mulf %101, %102 : vector<1x1xf32>
      %c0_67 = arith.constant 0 : index
      %c0_68 = arith.constant 0 : index
      %104 = vector.load %arg5[%c0_67, %c0_68] : memref<1x1xf32, #tpu.memory_space<vmem>>, vector<1x1xf32>
      tpu.vector_store %arg5[%c0_67, %c0_68], %103 {strides = array<i32>} : memref<1x1xf32, #tpu.memory_space<vmem>>, vector<1x1xf32>,
    } else {
    }
    return
  }
  func.func @transform_0(%arg0: i32, %arg1: memref<16xi32, #tpu.memory_space<smem>>) -> (i32, i32) {
    %c0_i32 = arith.constant 0 : i32
    %c0_i32_0 = arith.constant 0 : i32
    return %arg0, %c0_i32 : i32, i32
  }
  func.func @transform_2(%arg0: i32, %arg1: memref<16xi32, #tpu.memory_space<smem>>) -> (i32, i32) {
    %c0_i32 = arith.constant 0 : i32
    %c0_i32_0 = arith.constant 0 : i32
    return %arg0, %c0_i32 : i32, i32
  }
  func.func @transform_3(%arg0: i32, %arg1: memref<16xi32, #tpu.memory_space<smem>>) -> (i32, i32) {
    %c0_i32 = arith.constant 0 : i32
    %c0_i32_0 = arith.constant 0 : i32
    %c0_i32_1 = arith.constant 0 : i32
    return %c0_i32, %c0_i32_0 : i32, i32
  }
}

</mosaic_0001>

<bundles_post_ra>
// kernel: tpu_custom_call.1
= control target key start
LH: loop header
LB: loop body
LE: loop exit
PB: predicated region body
PF: predicated region fallthrough
CT: control target
= control target key end

     0   :  { %s2025_s0 = inlined_call_operand.vmem [shape: s32[16], index: 0, kind: input, shape index: {}]   ;;  %s2026_s1 = inlined_call_operand.vmem [shape: s32[16,1], index: 1, kind: input, shape index: {}]   ;;  %s2027_s2 = inlined_call_operand.hbm [shape: f32[32,128], index: 2, kind: input, shape index: {}]   ;;  %s2028_s3 = inlined_call_operand.hbm [shape: f32[16,128], index: 3, kind: output, shape index: {0}]   ;;  %s2029_s4 = inlined_call_operand.hbm [shape: f32[1,1], index: 4, kind: output, shape index: {1}]  }
   0x1   :  { %2039 = sst [smem:[#allocation69_spill]] %s2026_s1  ;;  %s10_s17 = sshll.u32 %s2025_s0, 4  ;;  %s11_s17 = int_to_ptr.vmem [resolvable:$true] %s10_s17 }
   0x2   :  { %2040 = sst [smem:[#allocation70_spill]] %s2029_s4  ;;  %s998_s18 = scalar_lea.vmem %s11_s17, 16 }
   0x3   :  { %p999_p0 = scmp.ne.s32.totalorder %s11_s17, %s998_s18  ;;  %p1003_p1 = scmp.lt.s32.totalorder %s11_s17, %s11_s17 }
   0x4   :  { %p1004_p2 = scmp.lt.s32.totalorder %s998_s18, %s998_s18 }
   0x6   :  { %p1005_p3 = por %p1004_p2, %p1003_p1 }
   0x8   :  { %p1006_p4 = pnand %p1005_p3, %p999_p0 }
   0xa   :  { %1009 = shalt.err (!%p1006_p4)  }
   0xb   :  { %s1502_s19 = smov [#allocation5]  }
   0xc   :  { %13 = dma.vmem_to_smem %s11_s17, 16, %s1502_s19, [#allocation4] }
   0xd   :  { %1460 = dma.done.wait [#allocation4], 16 }
   0xe   :  { %1461 = vsyncadd [#allocation4], 4294967280 }
   0xf   :  { %15 = sfence }
  0x10   :  { %16 = vsyncpa [#allocation7], 0 }
  0x11   :  { %18 = vsyncpa [#allocation7 + $0x1], 0 }
  0x12   :  { %19 = vsyncpa [#allocation9], 0  ;;  %s1544_s20 = smov 0   ;;  %s1546_s21 = smov 0  }
  0x13   :  { %s1548_s0 = smov 0   ;;  %s1550_s22 = smov 0  }
  0x14 LB: > { %2041 = sst [smem:[#allocation63_spill]] %s1488_s20  ;;  %s1565_s23 = sadd.s32 4294967295, %s1500_s22   ;;  %s1500_s22 = sphi %s1550_s22, %s2067_s22   ;;  %s1496_s0 = sphi %s1548_s0, %s2069_s0   ;;  %s1492_s21 = sphi %s1546_s21, %s2071_s21   ;;  %s1488_s20 = sphi %s1544_s20, %s2070_s20  }
  0x15   : > { %2042 = sst [smem:[#allocation64_spill]] %s1496_s0  ;;  %s829_s24 = sadd.s32 4294967294, %s1500_s22  }
  0x16   : > { %2043 = sst [smem:[#allocation65_spill]] %s1500_s22  ;;  %s1569_s25 = sadd.s32 1, %s1500_s22  }
  0x17   : > { %2044 = sst [smem:[#allocation66_spill]] %s1569_s25  ;;  %s58_s26 = sadd.s32 1, %s1496_s0 }
  0x18   : > { %s55_s27 = ssub.s32 %s1500_s22, %s1569_s25  ;;  %p68_p5 = scmp.ne.s32.totalorder %s1496_s0, %s1492_s21 }
  0x19   : > { %p56_p6 = scmp.eq.s32.totalorder %s55_s27, 0  ;;  %p2038_p7 = scmp.eq.s32.totalorder %s1565_s23, 1 }
  0x1a   : > { %p74_p8 = scmp.ne.s32.totalorder %s1492_s21, %s1488_s20  ;;  %p75_p9 = scmp.eq.s32.totalorder %s829_s24, 1 }
  0x1b   : > { %s1580_s28 = scalar_select %p56_p6, %s1496_s0, %s58_s26  }
  0x1c   : > { %p1584_p10 = por %p2038_p7, %p68_p5  ;;  %p1588_p11 = por %p75_p9, %p74_p8 }
  0x1d   : > { %2045 = sst [smem:[#allocation67_spill]] %s1580_s28  ;;  %p832_p12 = scmp.ge.s32.totalorder %s1500_s22, 1 }
  0x1e   : > { %s2047_s30 = scalar_select %p1588_p11, 1, 0 }
  0x1f   : > { %p121_p13 = scmp.lt.s32.totalorder %s1500_s22, 3 }
  0x20   : > { %2048 = sst [smem:[#allocation68_spill]] %s2047_s30 }
  0x21   : > { %p122_p0 = pnand %p832_p12, %p121_p13 }
  0x22   : > { %s2030_s5 = sand.u32 (!%p122_p0), 1, %s1492_s21   ;;  %p142_p1 = scmp.lt.s32.totalorder (!%p122_p0), %s1565_s23, 1 }
  0x23   : > { %125 = sbr.rel (%p122_p0) target bundleno = 825 (0x339), region = 24  ;;  %s1598_s6 = sshll.u32 (!%p122_p0), %s2030_s5, 3 }
  0x24   : > { %s2049_s1 = sld [smem:[#allocation69_spill]] (!%p122_p0)  ;;  %p835_p2 = scmp.ne.s32.totalorder (!%p122_p0), %s1565_s23, 0 }
  0x28   : > { %s143_s8 = scalar_select %p142_p1, %s1565_s23, 1 }
  0x29   : > { %150 = sbr.rel (%p835_p2) target bundleno = 202 (0xca), region = 28  ;;  %s153_s14 = sld [smem:[#allocation5]] (!%p835_p2) }
  0x2a   : > { %s834_s9 = sshll.u32 %s143_s8, 3  ;;  %s1503_s15 = smov (!%p835_p2), [#allocation2]  }
  0x2b   : > { %s1605_s12 = scalar_lea.vmem %s2049_s1, %s834_s9  ;;  %s163_s16 = sshll.u32 (!%p835_p2), %s1503_s15, 4  ;;  %s1611_s16 = int_to_ptr.vmem [resolvable:$true] %s163_s16 }
  0x2c   : > { %s1609_s17 = sld [smem:[#allocation5 + $0x1]] (!%p835_p2)  ;;  %s1505_s18 = smov (!%p835_p2), [#allocation2 + $0x1]  }
  0x2d   : > { %s179_s19 = sshll.u32 (!%p835_p2), %s1505_s18, 4  ;;  %s1613_s24 = sld [smem:[#allocation5 + $0x2]] (!%p835_p2)  ;;  %s1615_s19 = int_to_ptr.vmem [resolvable:$true] %s179_s19 }
  0x2e   : > { %vm151_vm0 = vcmask 0   ;;  %v1504_v0 = vmov 0.0   ;;  %s1506_s26 = smov [#allocation2 + $0x2]   ;;  %s1617_s8 = sld [smem:[#allocation5 + $0x3]] }
  0x2f   : > { %152 = vst.msk [vmem:[#allocation8] sm:$0x1] %vm151_vm0, %v1504_v0  ;;  %s195_s27 = sshll.u32 %s1506_s26, 4  ;;  %s836_s9 = sshll.u32 %s153_s14, 4  ;;  %s1619_s27 = int_to_ptr.vmem [resolvable:$true] %s195_s27 }
  0x30   : > { %s155_s15 = scalar_lea.hbm %s2027_s2, %s836_s9  ;;  %s1628_s1 = scalar_lea.hbm %s2027_s2, 512 }
  0x31   : > { %s1010_s13 = scalar_lea.hbm %s155_s15, 16  ;;  %p1013_p4 = scmp.lt.s32.totalorder %s155_s15, %s2027_s2 }
  0x32   : > { %s838_s5 = sshll.u32 %s1609_s17, 4  ;;  %p1011_p3 = scmp.ne.s32.totalorder %s155_s15, %s1010_s13 }
  0x33   : > { %p1014_p5 = scmp.lt.s32.totalorder %s1628_s1, %s1010_s13 }
  0x35   : > { %p1015_p6 = por %p1014_p5, %p1013_p4 }
  0x37   : > { %p1016_p8 = pnand %p1015_p6, %p1011_p3 }
  0x39   : > { %1019 = shalt.err (!%p1016_p8)  }
  0x3a   : > { %s1020_s14 = scalar_lea.vmem %s1611_s16, 16  ;;  %s1637_s17 = scalar_lea.vmem %s1611_s16, 256 }
  0x3b   : > { %p1021_p9 = scmp.ne.s32.totalorder %s1611_s16, %s1020_s14  ;;  %p1025_p12 = scmp.lt.s32.totalorder %s1611_s16, %s1611_s16 }
  0x3c   : > { %p1026_p13 = scmp.lt.s32.totalorder %s1637_s17, %s1020_s14 }
  0x3e   : > { %p1027_p0 = por %p1026_p13, %p1025_p12 }
  0x40   : > { %p1028_p1 = pnand %p1027_p0, %p1021_p9 }
  0x42   : > { %1031 = shalt.err (!%p1028_p1)  }
  0x43   : > { %166 = dma.hbm_to_vmem [thread:$0]  %s155_s15, 16, %s1611_s16, [#allocation3] }
  0x44   : > { %s169_s7 = scalar_lea.hbm %s2027_s2, %s838_s5  ;;  %s840_s13 = sshll.u32 %s1613_s24, 4 }
  0x45   : > { %s1032_s26 = scalar_lea.hbm %s169_s7, 16  ;;  %p1035_p3 = scmp.lt.s32.totalorder %s169_s7, %s2027_s2 }
  0x46   : > { %p1033_p2 = scmp.ne.s32.totalorder %s169_s7, %s1032_s26  ;;  %p1036_p4 = scmp.lt.s32.totalorder %s1628_s1, %s1032_s26 }
  0x48   : > { %p1037_p5 = por %p1036_p4, %p1035_p3 }
  0x4a   : > { %p1038_p6 = pnand %p1037_p5, %p1033_p2 }
  0x4c   : > { %1041 = shalt.err (!%p1038_p6)  }
  0x4d   : > { %s1042_s11 = scalar_lea.vmem %s1615_s19, 16  ;;  %p1047_p9 = scmp.lt.s32.totalorder %s1615_s19, %s1611_s16 }
  0x4e   : > { %p1043_p8 = scmp.ne.s32.totalorder %s1615_s19, %s1042_s11  ;;  %p1048_p12 = scmp.lt.s32.totalorder %s1637_s17, %s1042_s11 }
  0x50   : > { %p1049_p13 = por %p1048_p12, %p1047_p9 }
  0x52   : > { %p1050_p0 = pnand %p1049_p13, %p1043_p8 }
  0x54   : > { %1053 = shalt.err (!%p1050_p0)  }
  0x55   : > { %182 = dma.hbm_to_vmem [thread:$0]  %s169_s7, 16, %s1615_s19, [#allocation3 + $0x1] }
  0x56   : > { %s185_s15 = scalar_lea.hbm %s2027_s2, %s840_s13  ;;  %s842_s18 = sshll.u32 %s1617_s8, 4 }
  0x57   : > { %s1054_s14 = scalar_lea.hbm %s185_s15, 16  ;;  %p1057_p2 = scmp.lt.s32.totalorder %s185_s15, %s2027_s2 }
  0x58   : > { %p1055_p1 = scmp.ne.s32.totalorder %s185_s15, %s1054_s14  ;;  %p1058_p3 = scmp.lt.s32.totalorder %s1628_s1, %s1054_s14 }
  0x5a   : > { %p1059_p4 = por %p1058_p3, %p1057_p2 }
  0x5c   : > { %p1060_p5 = pnand %p1059_p4, %p1055_p1 }
  0x5e   : > { %1063 = shalt.err (!%p1060_p5)  }
  0x5f   : > { %s1064_s19 = scalar_lea.vmem %s1619_s27, 16  ;;  %p1069_p8 = scmp.lt.s32.totalorder %s1619_s27, %s1611_s16 }
  0x60   : > { %p1065_p6 = scmp.ne.s32.totalorder %s1619_s27, %s1064_s19  ;;  %p1070_p9 = scmp.lt.s32.totalorder %s1637_s17, %s1064_s19 }
  0x62   : > { %p1071_p12 = por %p1070_p9, %p1069_p8 }
  0x64   : > { %p1072_p13 = pnand %p1071_p12, %p1065_p6 }
  0x66   : > { %1075 = shalt.err (!%p1072_p13)  }
  0x67   : > { %198 = dma.hbm_to_vmem [thread:$0]  %s185_s15, 16, %s1619_s27, [#allocation3 + $0x2] }
  0x68   : > { %s201_s13 = scalar_lea.hbm %s2027_s2, %s842_s18  ;;  %s1507_s26 = smov [#allocation2 + $0x3]  }
  0x69   : > { %s211_s9 = sshll.u32 %s1507_s26, 4  ;;  %s843_s10 = sld [smem:[#allocation5 + $0x4]]  ;;  %s212_s9 = int_to_ptr.vmem [resolvable:$true] %s211_s9 }
  0x6a   : > { %s1076_s11 = scalar_lea.hbm %s201_s13, 16  ;;  %p1079_p1 = scmp.lt.s32.totalorder %s201_s13, %s2027_s2 }
  0x6b   : > { %p1077_p0 = scmp.ne.s32.totalorder %s201_s13, %s1076_s11  ;;  %p1080_p2 = scmp.lt.s32.totalorder %s1628_s1, %s1076_s11 }
  0x6d   : > { %p1081_p3 = por %p1080_p2, %p1079_p1 }
  0x6f   : > { %p1082_p4 = pnand %p1081_p3, %p1077_p0 }
  0x71   : > { %1085 = shalt.err (!%p1082_p4)  }
  0x72   : > { %s1086_s14 = scalar_lea.vmem %s212_s9, 16  ;;  %p1091_p6 = scmp.lt.s32.totalorder %s212_s9, %s1611_s16 }
  0x73   : > { %p1087_p5 = scmp.ne.s32.totalorder %s212_s9, %s1086_s14  ;;  %p1092_p8 = scmp.lt.s32.totalorder %s1637_s17, %s1086_s14 }
  0x75   : > { %p1093_p9 = por %p1092_p8, %p1091_p6 }
  0x77   : > { %p1094_p12 = pnand %p1093_p9, %p1087_p5 }
  0x79   : > { %1097 = shalt.err (!%p1094_p12)  }
  0x7a   : > { %214 = dma.hbm_to_vmem [thread:$0]  %s201_s13, 16, %s212_s9, [#allocation3 + $0x3] }
  0x7b   : > { %s1508_s27 = smov [#allocation2 + $0x4]   ;;  %s845_s18 = sld [smem:[#allocation5 + $0x5]] }
  0x7c   : > { %s227_s15 = sshll.u32 %s1508_s27, 4  ;;  %s1509_s0 = smov [#allocation2 + $0x5]   ;;  %s228_s15 = int_to_ptr.vmem [resolvable:$true] %s227_s15 }
  0x7d   : > { %s243_s28 = sshll.u32 %s1509_s0, 4  ;;  %s1680_s19 = sld [smem:[#allocation5 + $0x6]]  ;;  %s1682_s28 = int_to_ptr.vmem [resolvable:$true] %s243_s28 }
  0x7e   : > { %s844_s8 = sshll.u32 %s843_s10, 4 }
  0x7f   : > { %s217_s11 = scalar_lea.hbm %s2027_s2, %s844_s8 }
  0x80   : > { %s1098_s5 = scalar_lea.hbm %s217_s11, 16  ;;  %p1101_p0 = scmp.lt.s32.totalorder %s217_s11, %s2027_s2 }
  0x81   : > { %p1099_p13 = scmp.ne.s32.totalorder %s217_s11, %s1098_s5  ;;  %p1102_p1 = scmp.lt.s32.totalorder %s1628_s1, %s1098_s5 }
  0x83   : > { %p1103_p2 = por %p1102_p1, %p1101_p0 }
  0x85   : > { %p1104_p3 = pnand %p1103_p2, %p1099_p13 }
  0x87   : > { %1107 = shalt.err (!%p1104_p3)  }
  0x88   : > { %s1108_s9 = scalar_lea.vmem %s228_s15, 16  ;;  %p1113_p5 = scmp.lt.s32.totalorder %s228_s15, %s1611_s16 }
  0x89   : > { %p1109_p4 = scmp.ne.s32.totalorder %s228_s15, %s1108_s9  ;;  %p1114_p6 = scmp.lt.s32.totalorder %s1637_s17, %s1108_s9 }
  0x8b   : > { %p1115_p8 = por %p1114_p6, %p1113_p5 }
  0x8d   : > { %p1116_p9 = pnand %p1115_p8, %p1109_p4 }
  0x8f   : > { %1119 = shalt.err (!%p1116_p9)  }
  0x90   : > { %230 = dma.hbm_to_vmem [thread:$0]  %s217_s11, 16, %s228_s15, [#allocation3 + $0x4] }
  0x91   : > { %s846_s10 = sshll.u32 %s845_s18, 4  ;;  %s1510_s14 = smov [#allocation2 + $0x6]  }
  0x92   : > { %s259_s27 = sshll.u32 %s1510_s14, 4  ;;  %s233_s7 = scalar_lea.hbm %s2027_s2, %s846_s10  ;;  %s1696_s27 = int_to_ptr.vmem [resolvable:$true] %s259_s27 }
  0x93   : > { %s1120_s26 = scalar_lea.hbm %s233_s7, 16  ;;  %p1123_p13 = scmp.lt.s32.totalorder %s233_s7, %s2027_s2 }
  0x94   : > { %p1121_p12 = scmp.ne.s32.totalorder %s233_s7, %s1120_s26  ;;  %p1124_p0 = scmp.lt.s32.totalorder %s1628_s1, %s1120_s26 }
  0x96   : > { %p1125_p1 = por %p1124_p0, %p1123_p13 }
  0x98   : > { %p1126_p2 = pnand %p1125_p1, %p1121_p12 }
  0x9a   : > { %1129 = shalt.err (!%p1126_p2)  }
  0x9b   : > { %s1130_s15 = scalar_lea.vmem %s1682_s28, 16  ;;  %p1135_p4 = scmp.lt.s32.totalorder %s1682_s28, %s1611_s16 }
  0x9c   : > { %p1131_p3 = scmp.ne.s32.totalorder %s1682_s28, %s1130_s15  ;;  %p1136_p5 = scmp.lt.s32.totalorder %s1637_s17, %s1130_s15 }
  0x9e   : > { %p1137_p6 = por %p1136_p5, %p1135_p4 }
  0xa0   : > { %p1138_p8 = pnand %p1137_p6, %p1131_p3 }
  0xa2   : > { %1141 = shalt.err (!%p1138_p8)  }
  0xa3   : > { %246 = dma.hbm_to_vmem [thread:$0]  %s233_s7, 16, %s1682_s28, [#allocation3 + $0x5] }
  0xa4   : > { %s848_s18 = sshll.u32 %s1680_s19, 4  ;;  %s849_s11 = sld [smem:[#allocation5 + $0x7]] }
  0xa5   : > { %s249_s10 = scalar_lea.hbm %s2027_s2, %s848_s18 }
  0xa6   : > { %s1142_s14 = scalar_lea.hbm %s249_s10, 16  ;;  %p1145_p12 = scmp.lt.s32.totalorder %s249_s10, %s2027_s2 }
  0xa7   : > { %p1143_p9 = scmp.ne.s32.totalorder %s249_s10, %s1142_s14  ;;  %p1146_p13 = scmp.lt.s32.totalorder %s1628_s1, %s1142_s14 }
  0xa9   : > { %p1147_p0 = por %p1146_p13, %p1145_p12 }
  0xab   : > { %p1148_p1 = pnand %p1147_p0, %p1143_p9 }
  0xad   : > { %1151 = shalt.err (!%p1148_p1)  }
  0xae   : > { %s1152_s28 = scalar_lea.vmem %s1696_s27, 16  ;;  %p1157_p3 = scmp.lt.s32.totalorder %s1696_s27, %s1611_s16 }
  0xaf   : > { %p1153_p2 = scmp.ne.s32.totalorder %s1696_s27, %s1152_s28  ;;  %p1158_p4 = scmp.lt.s32.totalorder %s1637_s17, %s1152_s28 }
  0xb1   : > { %p1159_p5 = por %p1158_p4, %p1157_p3 }
  0xb3   : > { %p1160_p6 = pnand %p1159_p5, %p1153_p2 }
  0xb5   : > { %1163 = shalt.err (!%p1160_p6)  }
  0xb6   : > { %262 = dma.hbm_to_vmem [thread:$0]  %s249_s10, 16, %s1696_s27, [#allocation3 + $0x6] }
  0xb7   : > { %s1511_s19 = smov [#allocation2 + $0x7]   ;;  %s850_s26 = sshll.u32 %s849_s11, 4 }
  0xb8   : > { %s275_s7 = sshll.u32 %s1511_s19, 4  ;;  %s265_s15 = scalar_lea.hbm %s2027_s2, %s850_s26  ;;  %s276_s7 = int_to_ptr.vmem [resolvable:$true] %s275_s7 }
  0xb9   : > { %s1164_s18 = scalar_lea.hbm %s265_s15, 16  ;;  %p1167_p9 = scmp.lt.s32.totalorder %s265_s15, %s2027_s2 }
  0xba   : > { %p1165_p8 = scmp.ne.s32.totalorder %s265_s15, %s1164_s18  ;;  %p1168_p12 = scmp.lt.s32.totalorder %s1628_s1, %s1164_s18 }
  0xbc   : > { %p1169_p13 = por %p1168_p12, %p1167_p9 }
  0xbe   : > { %p1170_p0 = pnand %p1169_p13, %p1165_p8 }
  0xc0   : > { %1173 = shalt.err (!%p1170_p0)  }
  0xc1   : > { %s1174_s14 = scalar_lea.vmem %s276_s7, 16  ;;  %p1179_p2 = scmp.lt.s32.totalorder %s276_s7, %s1611_s16 }
  0xc2   : > { %p1175_p1 = scmp.ne.s32.totalorder %s276_s7, %s1174_s14  ;;  %p1180_p3 = scmp.lt.s32.totalorder %s1637_s17, %s1174_s14 }
  0xc4   : > { %p1181_p4 = por %p1180_p3, %p1179_p2 }
  0xc6   : > { %p1182_p5 = pnand %p1181_p4, %p1175_p1 }
  0xc8   : > { %1185 = shalt.err (!%p1182_p5)  }
  0xc9   : > { %278 = dma.hbm_to_vmem [thread:$0]  %s265_s15, 16, %s276_s7, [#allocation3 + $0x7] }
  0xca PF: > { %s2050_s27 = sand.u32 1, %s1565_s23 }
  0xcb   : > { %s1733_s11 = sshll.u32 %s2050_s27, 3 }
  0xcc   : > { %s280_s1 = scalar_lea.sflag [#allocation3], %s1733_s11 }
  0xcd   : > { %1462 = dma.done.wait %s280_s1, 16 }
  0xce   : > { %1463 = vsyncadd %s280_s1, 4294967280  ;;  %s711_s10 = scalar_lea.sflag %s280_s1, 1 [#allocation3] }
  0xcf   : > { %1464 = dma.done.wait %s711_s10, 16 }
  0xd0   : > { %1465 = vsyncadd %s711_s10, 4294967280  ;;  %s714_s0 = scalar_lea.sflag %s280_s1, 2 [#allocation3] }
  0xd1   : > { %1466 = dma.done.wait %s714_s0, 16 }
  0xd2   : > { %1467 = vsyncadd %s714_s0, 4294967280  ;;  %s717_s16 = scalar_lea.sflag %s280_s1, 3 [#allocation3] }
  0xd3   : > { %1468 = dma.done.wait %s717_s16, 16 }
  0xd4   : > { %1469 = vsyncadd %s717_s16, 4294967280  ;;  %s720_s17 = scalar_lea.sflag %s280_s1, 4 [#allocation3] }
  0xd5   : > { %1470 = dma.done.wait %s720_s17, 16 }
  0xd6   : > { %1471 = vsyncadd %s720_s17, 4294967280  ;;  %s723_s8 = scalar_lea.sflag %s280_s1, 5 [#allocation3] }
  0xd7   : > { %1472 = dma.done.wait %s723_s8, 16 }
  0xd8   : > { %1473 = vsyncadd %s723_s8, 4294967280  ;;  %s726_s28 = scalar_lea.sflag %s280_s1, 6 [#allocation3] }
  0xd9   : > { %1474 = dma.done.wait %s726_s28, 16 }
  0xda   : > { %1475 = vsyncadd %s726_s28, 4294967280  ;;  %s729_s19 = scalar_lea.sflag %s280_s1, 7 [#allocation3] }
  0xdb   : > { %1476 = dma.done.wait %s729_s19, 16 }
  0xdc   : > { %1477 = vsyncadd %s729_s19, 4294967280  ;;  %s312_s7 = sadd.s32 1, %s1565_s23  ;;  %s2051_s26 = smov %s2050_s27  ;;  %v1512_v1 = vmov 0  }
  0xdd   : > { %s317_s5 = ssub.s32 1, %s2051_s26  ;;  %p1739_p6 = scmp.lt.s32.totalorder %s312_s7, 2  ;;  %993 = vset.pattern.permute.xlu0 %v1512_v1 }
  0xde   : > { %s2032_s15 = sshll.u32 %s1565_s23, 3  ;;  %s861_s18 = sshll.u32 %s317_s5, 3 }
  0xdf   : > { %s1746_s13 = sadd.s32 8, %s2032_s15  ;;  %s1753_s1 = scalar_lea.vmem [#allocation2], %s861_s18 }
  0xe0   : > { %s911_s9 = scalar_select %p1739_p6, [#allocation5], [#allocation44] }
  0xe1   : > { %s912_s14 = scalar_select %p1739_p6, %s1746_s13, 0 }
  0xe2   : > { %s332_s10 = sshll.u32 %s1753_s1, 4  ;;  %s336_s0 = sadd.s32 1, %s1746_s13  ;;  %s1762_s10 = int_to_ptr.vmem [resolvable:$true] %s332_s10 }
  0xe3   : > { %s319_s27 = sld [smem:[%s911_s9 + %s912_s14]]  ;;  %s740_s16 = scalar_lea.vmem %s1753_s1, 1 [#allocation2] }
  0xe4   : > { %s914_s17 = scalar_select %p1739_p6, [#allocation5], [#allocation45] }
  0xe5   : > { %s2073_s0 = smov (!%p1739_p6, %s336_s0), 0  ;;  %s351_s8 = sshll.u32 %s740_s16, 4  ;;  %s1769_s8 = int_to_ptr.vmem [resolvable:$true] %s351_s8 }
  0xe6   : > { %s1764_s28 = sld [smem:[%s914_s17 + %s2073_s0]]  ;;  %s1766_s19 = scalar_lea.sflag [#allocation3], %s861_s18 }
  0xe7   : > { %s355_s15 = sadd.s32 2, %s1746_s13  ;;  %s1780_s18 = scalar_lea.hbm %s2027_s2, 512 }
  0xe9   : > { %s862_s26 = sshll.u32 %s319_s27, 4 }
  0xea   : > { %s322_s14 = scalar_lea.hbm %s2027_s2, %s862_s26 }
  0xeb   : > { %s1186_s25 = scalar_lea.hbm %s322_s14, 16  ;;  %p1191_p13 = scmp.lt.s32.totalorder %s322_s14, %s2027_s2 }
  0xec   : > { %p1187_p8 = scmp.ne.s32.totalorder %s322_s14, %s1186_s25  ;;  %p1192_p0 = scmp.lt.s32.totalorder %s1780_s18, %s1186_s25 }
  0xee   : > { %p1188_p9 = pnand %p1187_p8, %p1739_p6  ;;  %p1193_p1 = por %p1192_p0, %p1191_p13 }
  0xf0   : > { %p1189_p12 = pneg %p1188_p9 }
  0xf2   : > { %p1194_p2 = pnand %p1193_p1, %p1189_p12 }
  0xf4   : > { %1197 = shalt.err (!%p1194_p2)  }
  0xf5   : > { %s1198_s27 = scalar_lea.vmem %s1762_s10, 16  ;;  %s1513_s26 = smov [#allocation2]  }
  0xf6   : > { %p1199_p3 = scmp.ne.s32.totalorder %s1762_s10, %s1198_s27  ;;  %s1202_s5 = sshll.u32 %s1513_s26, 4  ;;  %s1790_s5 = int_to_ptr.vmem [resolvable:$false] %s1202_s5 }
  0xf7   : > { %s1793_s7 = scalar_lea.vmem %s1790_s5, 256  ;;  %p1205_p8 = scmp.lt.s32.totalorder %s1762_s10, %s1790_s5 }
  0xf8   : > { %p1200_p4 = pnand %p1199_p3, %p1739_p6  ;;  %p1206_p9 = scmp.lt.s32.totalorder %s1793_s7, %s1198_s27 }
  0xfa   : > { %p1201_p5 = pneg %p1200_p4  ;;  %p1207_p12 = por %p1206_p9, %p1205_p8 }
  0xfc   : > { %p1208_p13 = pnand %p1207_p12, %p1201_p5 }
  0xfe   : > { %1211 = shalt.err (!%p1208_p13)  }
  0xff   : > { %913 = dma.hbm_to_vmem [thread:$0]  (%p1739_p6), %s322_s14, 16, %s1762_s10, %s1766_s19 }
 0x100   : > { %s917_s25 = scalar_select %p1739_p6, [#allocation5], [#allocation46] }
 0x101   : > { %s2075_s15 = smov (!%p1739_p6, %s355_s15), 0  ;;  %s863_s9 = sshll.u32 %s1764_s28, 4 }
 0x102   : > { %s748_s16 = scalar_lea.vmem %s1753_s1, 2 [#allocation2]  ;;  %s340_s27 = scalar_lea.hbm %s2027_s2, %s863_s9 }
 0x103   : > { %s1811_s26 = sld [smem:[%s917_s25 + %s2075_s15]]  ;;  %s1212_s30 = scalar_lea.hbm %s340_s27, 16 }
 0x104   : > { %p1213_p0 = scmp.ne.s32.totalorder %s340_s27, %s1212_s30  ;;  %p1217_p3 = scmp.lt.s32.totalorder %s340_s27, %s2027_s2 }
 0x105   : > { %p1218_p4 = scmp.lt.s32.totalorder %s1780_s18, %s1212_s30 }
 0x106   : > { %p1214_p1 = pnand %p1213_p0, %p1739_p6 }
 0x107   : > { %p1219_p5 = por %p1218_p4, %p1217_p3 }
 0x108   : > { %p1215_p2 = pneg %p1214_p1 }
 0x10a   : > { %p1220_p8 = pnand %p1219_p5, %p1215_p2 }
 0x10c   : > { %1223 = shalt.err (!%p1220_p8)  }
 0x10d   : > { %s1224_s15 = scalar_lea.vmem %s1769_s8, 16  ;;  %p1231_p0 = scmp.lt.s32.totalorder %s1769_s8, %s1790_s5 }
 0x10e   : > { %p1225_p9 = scmp.ne.s32.totalorder %s1769_s8, %s1224_s15  ;;  %p1232_p1 = scmp.lt.s32.totalorder %s1793_s7, %s1224_s15 }
 0x110   : > { %p1226_p12 = pnand %p1225_p9, %p1739_p6  ;;  %p1233_p7 = por %p1232_p1, %p1231_p0 }
 0x112   : > { %p1227_p13 = pneg %p1226_p12 }
 0x114   : > { %p1234_p11 = pnand %p1233_p7, %p1227_p13 }
 0x116   : > { %1237 = shalt.err (!%p1234_p11)  }
 0x117   : > { %s2053_s20 = scalar_lea.sflag %s1766_s19, 1 [#allocation3]  ;;  %s370_s22 = sshll.u32 %s748_s16, 4  ;;  %s371_s22 = int_to_ptr.vmem [resolvable:$true] %s370_s22 }
 0x118   : > { %916 = dma.hbm_to_vmem [thread:$0]  (%p1739_p6), %s340_s27, 16, %s1769_s8, %s2053_s20 }
 0x119   : > { %s374_s30 = sadd.s32 3, %s1746_s13  ;;  %s751_s10 = scalar_lea.sflag %s1766_s19, 2 [#allocation3] }
 0x11a   : > { %s920_s28 = scalar_select %p1739_p6, [#allocation5], [#allocation47] }
 0x11b   : > { %s2077_s30 = smov (!%p1739_p6, %s374_s30), 0  ;;  %s866_s14 = sshll.u32 %s1811_s26, 4 }
 0x11c   : > { %s756_s25 = scalar_lea.vmem %s1753_s1, 3 [#allocation2]  ;;  %s359_s17 = scalar_lea.hbm %s2027_s2, %s866_s14 }
 0x11d   : > { %s1842_s15 = sld [smem:[%s920_s28 + %s2077_s30]]  ;;  %s1238_s4 = scalar_lea.hbm %s359_s17, 16 }
 0x11e   : > { %p1239_p7 = scmp.ne.s32.totalorder %s359_s17, %s1238_s4  ;;  %p1243_p3 = scmp.lt.s32.totalorder %s359_s17, %s2027_s2 }
 0x11f   : > { %p1244_p4 = scmp.lt.s32.totalorder %s1780_s18, %s1238_s4 }
 0x120   : > { %p1240_p11 = pnand %p1239_p7, %p1739_p6 }
 0x121   : > { %p1245_p5 = por %p1244_p4, %p1243_p3 }
 0x122   : > { %p1241_p2 = pneg %p1240_p11 }
 0x124   : > { %p1246_p8 = pnand %p1245_p5, %p1241_p2 }
 0x126   : > { %1249 = shalt.err (!%p1246_p8)  }
 0x127   : > { %s1250_s27 = scalar_lea.vmem %s371_s22, 16  ;;  %p1257_p0 = scmp.lt.s32.totalorder %s371_s22, %s1790_s5 }
 0x128   : > { %p1251_p9 = scmp.ne.s32.totalorder %s371_s22, %s1250_s27  ;;  %p1258_p1 = scmp.lt.s32.totalorder %s1793_s7, %s1250_s27 }
 0x12a   : > { %p1252_p12 = pnand %p1251_p9, %p1739_p6  ;;  %p1259_p7 = por %p1258_p1, %p1257_p0 }
 0x12c   : > { %p1253_p13 = pneg %p1252_p12 }
 0x12e   : > { %p1260_p11 = pnand %p1259_p7, %p1253_p13 }
 0x130   : > { %1263 = shalt.err (!%p1260_p11)  }
 0x131   : > { %919 = dma.hbm_to_vmem [thread:$0]  (%p1739_p6), %s359_s17, 16, %s371_s22, %s751_s10 }
 0x132   : > { %s389_s4 = sshll.u32 %s756_s25, 4  ;;  %s393_s26 = sadd.s32 4, %s1746_s13  ;;  %s390_s4 = int_to_ptr.vmem [resolvable:$true] %s389_s4 }
 0x133   : > { %s759_s20 = scalar_lea.sflag %s1766_s19, 3 [#allocation3]  ;;  %s2079_s26 = smov (!%p1739_p6, %s393_s26), 0 }
 0x134   : > { %s923_s30 = scalar_select %p1739_p6, [#allocation5], [#allocation48] }
 0x135   : > { %s869_s28 = sshll.u32 %s1842_s15, 4  ;;  %s764_s14 = scalar_lea.vmem %s1753_s1, 4 [#allocation2] }
 0x136   : > { %s378_s8 = scalar_lea.hbm %s2027_s2, %s869_s28  ;;  %s1867_s16 = sld [smem:[%s923_s30 + %s2079_s26]] }
 0x137   : > { %s1264_s27 = scalar_lea.hbm %s378_s8, 16  ;;  %p1269_p5 = scmp.lt.s32.totalorder %s378_s8, %s2027_s2 }
 0x138   : > { %p1265_p2 = scmp.ne.s32.totalorder %s378_s8, %s1264_s27  ;;  %p1270_p8 = scmp.lt.s32.totalorder %s1780_s18, %s1264_s27 }
 0x13a   : > { %p1266_p3 = pnand %p1265_p2, %p1739_p6  ;;  %p1271_p9 = por %p1270_p8, %p1269_p5 }
 0x13c   : > { %p1267_p4 = pneg %p1266_p3 }
 0x13e   : > { %p1272_p12 = pnand %p1271_p9, %p1267_p4 }
 0x140   : > { %1275 = shalt.err (!%p1272_p12)  }
 0x141   : > { %s1276_s25 = scalar_lea.vmem %s390_s4, 16  ;;  %p1283_p7 = scmp.lt.s32.totalorder %s390_s4, %s1790_s5 }
 0x142   : > { %p1277_p13 = scmp.ne.s32.totalorder %s390_s4, %s1276_s25  ;;  %p1284_p11 = scmp.lt.s32.totalorder %s1793_s7, %s1276_s25 }
 0x144   : > { %p1278_p0 = pnand %p1277_p13, %p1739_p6  ;;  %p1285_p2 = por %p1284_p11, %p1283_p7 }
 0x146   : > { %p1279_p1 = pneg %p1278_p0 }
 0x148   : > { %p1286_p3 = pnand %p1285_p2, %p1279_p1 }
 0x14a   : > { %1289 = shalt.err (!%p1286_p3)  }
 0x14b   : > { %922 = dma.hbm_to_vmem [thread:$0]  (%p1739_p6), %s378_s8, 16, %s390_s4, %s759_s20 }
 0x14c   : > { %s408_s17 = sshll.u32 %s764_s14, 4  ;;  %s412_s15 = sadd.s32 5, %s1746_s13  ;;  %s409_s17 = int_to_ptr.vmem [resolvable:$true] %s408_s17 }
 0x14d   : > { %s767_s26 = scalar_lea.sflag %s1766_s19, 4 [#allocation3]  ;;  %s2081_s15 = smov (!%p1739_p6, %s412_s15), 0 }
 0x14e   : > { %s926_s30 = scalar_select %p1739_p6, [#allocation5], [#allocation49] }
 0x14f   : > { %s872_s28 = sshll.u32 %s1867_s16, 4  ;;  %s772_s9 = scalar_lea.vmem %s1753_s1, 5 [#allocation2] }
 0x150   : > { %s397_s22 = scalar_lea.hbm %s2027_s2, %s872_s28  ;;  %s1892_s10 = sld [smem:[%s926_s30 + %s2081_s15]] }
 0x151   : > { %s1290_s25 = scalar_lea.hbm %s397_s22, 16  ;;  %p1295_p9 = scmp.lt.s32.totalorder %s397_s22, %s2027_s2 }
 0x152   : > { %p1291_p4 = scmp.ne.s32.totalorder %s397_s22, %s1290_s25  ;;  %p1296_p12 = scmp.lt.s32.totalorder %s1780_s18, %s1290_s25 }
 0x154   : > { %p1292_p5 = pnand %p1291_p4, %p1739_p6  ;;  %p1297_p13 = por %p1296_p12, %p1295_p9 }
 0x156   : > { %p1293_p8 = pneg %p1292_p5 }
 0x158   : > { %p1298_p0 = pnand %p1297_p13, %p1293_p8 }
 0x15a   : > { %1301 = shalt.err (!%p1298_p0)  }
 0x15b   : > { %s1302_s14 = scalar_lea.vmem %s409_s17, 16  ;;  %p1309_p2 = scmp.lt.s32.totalorder %s409_s17, %s1790_s5 }
 0x15c   : > { %p1303_p1 = scmp.ne.s32.totalorder %s409_s17, %s1302_s14  ;;  %p1310_p3 = scmp.lt.s32.totalorder %s1793_s7, %s1302_s14 }
 0x15e   : > { %p1304_p7 = pnand %p1303_p1, %p1739_p6  ;;  %p1311_p4 = por %p1310_p3, %p1309_p2 }
 0x160   : > { %p1305_p11 = pneg %p1304_p7 }
 0x162   : > { %p1312_p5 = pnand %p1311_p4, %p1305_p11 }
 0x164   : > { %1315 = shalt.err (!%p1312_p5)  }
 0x165   : > { %925 = dma.hbm_to_vmem [thread:$0]  (%p1739_p6), %s397_s22, 16, %s409_s17, %s767_s26 }
 0x166   : > { %s427_s8 = sshll.u32 %s772_s9, 4  ;;  %s431_s16 = sadd.s32 6, %s1746_s13  ;;  %s428_s8 = int_to_ptr.vmem [resolvable:$true] %s427_s8 }
 0x167   : > { %s775_s15 = scalar_lea.sflag %s1766_s19, 5 [#allocation3]  ;;  %s2083_s16 = smov (!%p1739_p6, %s431_s16), 0 }
 0x168   : > { %s929_s30 = scalar_select %p1739_p6, [#allocation5], [#allocation50] }
 0x169   : > { %s875_s28 = sshll.u32 %s1892_s10, 4  ;;  %s780_s0 = scalar_lea.vmem %s1753_s1, 6 [#allocation2] }
 0x16a   : > { %s416_s4 = scalar_lea.hbm %s2027_s2, %s875_s28  ;;  %s1917_s20 = sld [smem:[%s929_s30 + %s2083_s16]] }
 0x16b   : > { %s1316_s14 = scalar_lea.hbm %s416_s4, 16  ;;  %p1321_p13 = scmp.lt.s32.totalorder %s416_s4, %s2027_s2 }
 0x16c   : > { %p1317_p8 = scmp.ne.s32.totalorder %s416_s4, %s1316_s14  ;;  %p1322_p0 = scmp.lt.s32.totalorder %s1780_s18, %s1316_s14 }
 0x16e   : > { %p1318_p9 = pnand %p1317_p8, %p1739_p6  ;;  %p1323_p1 = por %p1322_p0, %p1321_p13 }
 0x170   : > { %p1319_p12 = pneg %p1318_p9 }
 0x172   : > { %p1324_p7 = pnand %p1323_p1, %p1319_p12 }
 0x174   : > { %1327 = shalt.err (!%p1324_p7)  }
 0x175   : > { %s1328_s9 = scalar_lea.vmem %s428_s8, 16  ;;  %p1335_p4 = scmp.lt.s32.totalorder %s428_s8, %s1790_s5 }
 0x176   : > { %p1329_p11 = scmp.ne.s32.totalorder %s428_s8, %s1328_s9  ;;  %p1336_p5 = scmp.lt.s32.totalorder %s1793_s7, %s1328_s9 }
 0x178   : > { %p1330_p2 = pnand %p1329_p11, %p1739_p6  ;;  %p1337_p8 = por %p1336_p5, %p1335_p4 }
 0x17a   : > { %p1331_p3 = pneg %p1330_p2 }
 0x17c   : > { %p1338_p9 = pnand %p1337_p8, %p1331_p3 }
 0x17e   : > { %1341 = shalt.err (!%p1338_p9)  }
 0x17f   : > { %928 = dma.hbm_to_vmem [thread:$0]  (%p1739_p6), %s416_s4, 16, %s428_s8, %s775_s15 }
 0x180   : > { %s446_s22 = sshll.u32 %s780_s0, 4  ;;  %s450_s10 = sadd.s32 7, %s1746_s13  ;;  %s447_s22 = int_to_ptr.vmem [resolvable:$true] %s446_s22 }
 0x181   : > { %s783_s16 = scalar_lea.sflag %s1766_s19, 6 [#allocation3]  ;;  %s2085_s10 = smov (!%p1739_p6, %s450_s10), 0 }
 0x182   : > { %s932_s30 = scalar_select %p1739_p6, [#allocation5], [#allocation51] }
 0x183   : > { %s878_s28 = sshll.u32 %s1917_s20, 4  ;;  %s788_s27 = scalar_lea.vmem %s1753_s1, 7 [#allocation2] }
 0x184   : > { %s435_s17 = scalar_lea.hbm %s2027_s2, %s878_s28  ;;  %s451_s26 = sld [smem:[%s932_s30 + %s2085_s10]] }
 0x185   : > { %s1342_s9 = scalar_lea.hbm %s435_s17, 16  ;;  %p1347_p1 = scmp.lt.s32.totalorder %s435_s17, %s2027_s2 }
 0x186   : > { %p1343_p12 = scmp.ne.s32.totalorder %s435_s17, %s1342_s9  ;;  %p1348_p7 = scmp.lt.s32.totalorder %s1780_s18, %s1342_s9 }
 0x188   : > { %p1344_p13 = pnand %p1343_p12, %p1739_p6  ;;  %p1349_p11 = por %p1348_p7, %p1347_p1 }
 0x18a   : > { %p1345_p0 = pneg %p1344_p13 }
 0x18c   : > { %p1350_p2 = pnand %p1349_p11, %p1345_p0 }
 0x18e   : > { %1353 = shalt.err (!%p1350_p2)  }
 0x18f   : > { %s1354_s15 = scalar_lea.vmem %s447_s22, 16  ;;  %p1361_p8 = scmp.lt.s32.totalorder %s447_s22, %s1790_s5 }
 0x190   : > { %p1355_p3 = scmp.ne.s32.totalorder %s447_s22, %s1354_s15  ;;  %p1362_p9 = scmp.lt.s32.totalorder %s1793_s7, %s1354_s15 }
 0x192   : > { %p1356_p4 = pnand %p1355_p3, %p1739_p6  ;;  %p1363_p12 = por %p1362_p9, %p1361_p8 }
 0x194   : > { %p1357_p5 = pneg %p1356_p4 }
 0x196   : > { %p1364_p13 = pnand %p1363_p12, %p1357_p5 }
 0x198   : > { %1367 = shalt.err (!%p1364_p13)  }
 0x199   : > { %931 = dma.hbm_to_vmem [thread:$0]  (%p1739_p6), %s435_s17, 16, %s447_s22, %s783_s16  ;;  %v472_v2 = vlaneseq }
 0x19a   : > { %s465_s1 = sshll.u32 %s788_s27, 4  ;;  %s791_s0 = scalar_lea.sflag %s1766_s19, 7 [#allocation3]  ;;  %s466_s1 = int_to_ptr.vmem [resolvable:$true] %s465_s1 }
 0x19b   : > { %s881_s4 = sshll.u32 %s451_s26, 4 }
 0x19c   : > { %s454_s30 = scalar_lea.hbm %s2027_s2, %s881_s4 }
 0x19d   : > { %s1368_s28 = scalar_lea.hbm %s454_s30, 16  ;;  %p1373_p11 = scmp.lt.s32.totalorder %s454_s30, %s2027_s2 }
 0x19e   : > { %p1369_p0 = scmp.ne.s32.totalorder %s454_s30, %s1368_s28  ;;  %p1374_p2 = scmp.lt.s32.totalorder %s1780_s18, %s1368_s28 }
 0x1a0   : > { %p1370_p1 = pnand %p1369_p0, %p1739_p6  ;;  %p1375_p3 = por %p1374_p2, %p1373_p11 }
 0x1a2   : > { %p1371_p7 = pneg %p1370_p1 }
 0x1a4   : > { %p1376_p4 = pnand %p1375_p3, %p1371_p7 }
 0x1a6   : > { %1379 = shalt.err (!%p1376_p4)  }
 0x1a7   : > { %s1380_s19 = scalar_lea.vmem %s466_s1, 16  ;;  %p1387_p12 = scmp.lt.s32.totalorder %s466_s1, %s1790_s5 }
 0x1a8   : > { %p1381_p5 = scmp.ne.s32.totalorder %s466_s1, %s1380_s19  ;;  %p1388_p13 = scmp.lt.s32.totalorder %s1793_s7, %s1380_s19 }
 0x1aa   : > { %p1382_p8 = pnand %p1381_p5, %p1739_p6  ;;  %p1389_p0 = por %p1388_p13, %p1387_p12 }
 0x1ac   : > { %p1383_p9 = pneg %p1382_p8 }
 0x1ae   : > { %p1390_p1 = pnand %p1389_p0, %p1383_p9 }
 0x1b0   : > { %1393 = shalt.err (!%p1390_p1)  }
 0x1b1   : > { %934 = dma.hbm_to_vmem [thread:$0]  (%p1739_p6), %s454_s30, 16, %s466_s1, %s791_s0  ;;  %v473_v3 = vand.u32 127, %v472_v2  ;;  %v487_v6 = vld [vmem:[%s1605_s12] sm:$0xff]  ;;  %v497_v15 = vshrl.u32 %v472_v2, 7  ;;  %vm511_vm4 = vcmask 0  }
 0x1b2   : > { %s469_s18 = scalar_lea.vmem [#allocation2], %s1733_s11  ;;  %s2054_s22 = scalar_lea.vmem [#allocation6], %s1598_s6  ;;  %v503_v29 = vld [vmem:[#allocation8] sm:$0x1] }
 0x1b3   : > { %vm474_vm1 = vcmp.lt.s32.totalorder %v473_v3, 32  ;;  %v470_v4 = vld [vmem:[%s469_s18] sm:$0xff]  ;;  %s2055_s11 = sshll.u32 %s1565_s23, 3  ;;  %p885_p6 = scmp.ne.s32.totalorder %s1565_s23, 1 }
 0x1b4   : > { %v475_v5 = vsel %vm474_vm1, %v470_v4, -1e+30  ;;  %471 = vst [vmem:[%s2054_s22] sm:$0xff] %v470_v4  ;;  %v498_v16 = vstv %s2055_s11 }
 0x1b5   : > { %476 = vmax.xlane.f32.xlu0 %v475_v5  ;;  %v499_v18 = vadd.s32 %v498_v16, %v497_v15 }
 0x1b7   : > { %vm500_vm3 = vcmp.lt.s32.totalorder %v499_v18, 16 }
 0x1cb   : > { %489 = vperm.xlu0 %993, %v487_v6  }
 0x23e   : > { %v477_v7 = vpop.xlane.xlu0 %476 }
 0x23f   : > { %v478_v8 = vsub.f32 %v475_v5, %v477_v7 }
 0x241   : > { %v479_v9 = vmul.f32 1.442695, %v478_v8 }
 0x243   : > { %994 = vpow2.f32 %v479_v9 }
 0x246   : > { %v490_v10 = vpop.permute.xlu0 %489 }
 0x247   : > { %vm491_vm2 = vcmp.eq.s32.totalorder %v473_v3, %v490_v10 }
 0x248   : > { %v492_v13 = vsel %vm491_vm2, %v470_v4, 0.0 }
 0x250   : > { %v995_v11 = vpop.eup %994 }
 0x251   : > { %v481_v12 = vsel %vm474_vm1, %v995_v11, 0.0 }
 0x252   : > { %482 = vadd.xlane.f32.xlu1 %v481_v12 }
 0x256   : > { %493 = vadd.xlane.f32.xlu1 %v492_v13 }
 0x2db   : > { %v483_v14 = vpop.xlane.xlu1 %482 }
 0x2dc   : > { %996 = vlog2.f32 %v483_v14 }
 0x2df   : > { %v494_v20 = vpop.xlane.xlu1 %493 }
 0x2e9   : > { %v997_v17 = vpop.eup %996 }
 0x2ea   : > { %v485_v19 = vmul.f32 0.6931472, %v997_v17 }
 0x2ec   : > { %v486_v21 = vadd.f32 %v485_v19, %v477_v7 }
 0x2ee   : > { %v501_v22 = vsub.f32 %v486_v21, %v494_v20 }
 0x2f0   : > { %v502_v23 = vsel %vm500_vm3, %v501_v22, 0.0 }
 0x2f1   : > { %v504_v24 = vrot.slane %v502_v23, 4 }
 0x2f3   : > { %v505_v25 = vadd.f32 %v504_v24, %v502_v23 }
 0x2f5   : > { %v506_v26 = vrot.slane %v505_v25, 2 }
 0x2f7   : > { %v507_v27 = vadd.f32 %v506_v26, %v505_v25 }
 0x2f9   : > { %v508_v28 = vrot.slane %v507_v27, 1 }
 0x2fb   : > { %v509_v30 = vadd.f32 %v508_v28, %v507_v27  ;;  %516 = sbr.rel (%p885_p6) target bundleno = 778 (0x30a), region = 100 }
 0x2fd   : > { %v510_v31 = vadd.f32 %v509_v30, %v503_v29 }
 0x2ff   : > { %512 = vst.msk [vmem:[#allocation8] sm:$0x1] %vm511_vm4, %v510_v31 }
 0x306   : > { %v517_v32 = vld [vmem:[#allocation8] sm:$0x1] }
 0x307   : > { %v518_v33 = vmul.f32 0.0625, %v517_v32 }
 0x309   : > { %519 = vst.msk [vmem:[#allocation8] sm:$0x1] %vm511_vm4, %v518_v33 }
 0x30a PF: > { %s887_s12 = sshll.u32 %s1565_s23, 7  ;;  %s2056_s16 = scalar_lea.vmem [#allocation6], %s1598_s6 }
 0x30b   : > { %s532_s7 = scalar_lea.hbm %s2028_s3, %s887_s12  ;;  %s534_s27 = sshll.u32 %s2056_s16, 4  ;;  %s535_s27 = int_to_ptr.vmem [resolvable:$true] %s534_s27 }
 0x30c   : > { %s2057_s17 = sand.u32 1, %s1492_s21   ;;  %s1394_s9 = scalar_lea.vmem %s535_s27, 128 }
 0x30d   : > { %s521_s26 = scalar_lea.sflag [#allocation7], %s2057_s17  ;;  %p1395_p7 = scmp.ne.s32.totalorder %s535_s27, %s1394_s9 }
 0x30e   : > { %s1514_s8 = smov [#allocation6]  }
 0x30f   : > { %p1396_p11 = pnand %p1395_p7, %p1584_p10  ;;  %s1398_s13 = sshll.u32 %s1514_s8, 4  ;;  %s1399_s13 = int_to_ptr.vmem [resolvable:$false] %s1398_s13 }
 0x310   : > { %s1400_s15 = scalar_lea.vmem %s1399_s13, 256  ;;  %p1401_p3 = scmp.lt.s32.totalorder %s535_s27, %s1399_s13 }
 0x311   : > { %p1397_p2 = pneg %p1396_p11  ;;  %p1402_p4 = scmp.lt.s32.totalorder %s1400_s15, %s1394_s9 }
 0x313   : > { %p1403_p5 = por %p1402_p4, %p1401_p3 }
 0x315   : > { %p1404_p8 = pnand %p1403_p5, %p1397_p2 }
 0x317   : > { %1407 = shalt.err (!%p1404_p8)
}
 0x318   : > { %s1408_s1 = scalar_lea.hbm %s532_s7, 128  ;;  %s1412_s4 = scalar_lea.hbm %s2028_s3, 256 }
 0x319   : > { %p1409_p9 = scmp.ne.s32.totalorder %s532_s7, %s1408_s1  ;;  %p1413_p0 = scmp.lt.s32.totalorder %s532_s7, %s2028_s3 }
 0x31a   : > { %p1414_p1 = scmp.lt.s32.totalorder %s1412_s4, %s1408_s1 }
 0x31b   : > { %p1410_p12 = pnand %p1409_p9, %p1584_p10 }
 0x31c   : > { %p1415_p6 = por %p1414_p1, %p1413_p0 }
 0x31d   : > { %p1411_p13 = pneg %p1410_p12 }
 0x31f   : > { %p1416_p7 = pnand %p1415_p6, %p1411_p13 }
 0x321   : > { %1419 = shalt.err (!%p1416_p7)
}
 0x322   : > { %935 = dma.vmem_to_hbm [thread:$0]  (%p1584_p10), %s535_s27, 128, %s532_s7, %s521_s26  }
 0x323   : > { %s1515_s30 = smov [#allocation8]   ;;  %p2058_p2 = scmp.eq.s32.totalorder %s1565_s23, 1 }
 0x324   : > { %s545_s28 = sshll.u32 %s1515_s30, 4  ;;  %s546_s28 = int_to_ptr.vmem [resolvable:$true] %s545_s28 }
 0x325   : > { %s1420_s25 = scalar_lea.vmem %s546_s28, 16  ;;  %s1426_s14 = scalar_lea.vmem %s546_s28, 32 }
 0x326   : > { %p1421_p11 = scmp.ne.s32.totalorder %s546_s28, %s1420_s25  ;;  %p1427_p5 = scmp.lt.s32.totalorder %s546_s28, %s546_s28 }
 0x327   : > { %p1428_p8 = scmp.lt.s32.totalorder %s1426_s14, %s1420_s25 }
 0x328   : > { %p1422_p3 = pnand %p1421_p11, %p2058_p2 }
 0x329   : > { %p1429_p9 = por %p1428_p8, %p1427_p5 }
 0x32a   : > { %p1423_p4 = pneg %p1422_p3 }
 0x32c   : > { %p1430_p12 = pnand %p1429_p9, %p1423_p4 }
 0x32e   : > { %1433 = shalt.err (!%p1430_p12)
}
 0x32f   : > { %p2059_p13 = pmov %p2058_p2  ;;  %s2060_s18 = sld [smem:[#allocation70_spill]] }
 0x330   : > { %p2061_p10 = pmov %p2058_p2 }
 0x335   : > { %937 = dma.vmem_to_hbm [thread:$0]  (%p2059_p13), %s546_s28, 16, %s2060_s18, [#allocation9]  }
 0x336   : > { %1479 = dma.done.wait (%p2061_p10), [#allocation9], 16   ;;  %p2062_p0 = pmov %p2058_p2 }
 0x338   : > { %1481 = vsyncadd (%p2062_p0), [#allocation9], 4294967280 }
 0x339 PF: > { %s2063_s22 = sld [smem:[#allocation65_spill]] }
 0x33a   : > { %s2064_s11 = sld [smem:[#allocation63_spill]] }
 0x33b   : > { %s2065_s12 = sld [smem:[#allocation68_spill]] }
 0x33f   : > { %p948_p1 = scmp.ge.s32.totalorder %s2063_s22, 2 }
 0x340   : > { %s561_s24 = sand.u32 1, %s2064_s11  }
 0x341   : > { %p2066_p6 = scmp.ne.s32.totalorder %s2065_s12, 0  ;;  %s562_s5 = scalar_lea.sflag [#allocation7], %s561_s24 }
 0x343   : > { %p942_p7 = pnand %p948_p1, %p2066_p6 }
 0x345   : > { %p943_p11 = pneg %p942_p7 }
 0x347   : > { %1483 = dma.done.wait (%p943_p11), %s562_s5, 128  }
 0x348   : > { %1485 = vsyncadd (%p943_p11), %s562_s5, 4294967168  ;;  %s2067_s22 = sld [smem:[#allocation66_spill]]  ;;  %s2070_s20 = smov %s1492_s21 }
 0x349   : > { %s2068_s7 = sld [smem:[#allocation64_spill]] }
 0x34a   : > { %s2069_s0 = sld [smem:[#allocation67_spill]] }
 0x34e   : > { %p22_p2 = scmp.ge.s32.totalorder %s2067_s22, 4  }
 0x34f   : > { %s2071_s21 = smov %s2068_s7 }
 0x350   :  { %24 = sbr.rel (!%p22_p2) target bundleno = 20 (0x14), region = 213 }
 0x355   :  { %567 = vsyncpa [#allocation7], 1 }
 0x356   :  { %569 = vsyncpa [#allocation7 + $0x1], 1 }
 0x357   :  { %570 = vsyncpa [#allocation9], 1 }
 0x358   :  { %571 = vsyncmov [#allocation3] }
 0x35b   :  { %s572_s23 = vpop.sfrf %571 }
 0x35c   :  { %p892_p3 = scmp.ne.s32.totalorder %s572_s23, 0 }
 0x35e   :  { %576 = shalt.err (%p892_p3)  }
 0x35f   :  { %578 = vsyncmov [#allocation3 + $0x1] }
 0x362   :  { %s579_s16 = vpop.sfrf %578 }
 0x363   :  { %p893_p4 = scmp.ne.s32.totalorder %s579_s16, 0 }
 0x365   :  { %583 = shalt.err (%p893_p4)  }
 0x366   :  { %585 = vsyncmov [#allocation3 + $0x2] }
 0x369   :  { %s586_s27 = vpop.sfrf %585 }
 0x36a   :  { %p894_p5 = scmp.ne.s32.totalorder %s586_s27, 0 }
 0x36c   :  { %590 = shalt.err (%p894_p5)  }
 0x36d   :  { %592 = vsyncmov [#allocation3 + $0x3] }
 0x370   :  { %s593_s17 = vpop.sfrf %592 }
 0x371   :  { %p895_p8 = scmp.ne.s32.totalorder %s593_s17, 0 }
 0x373   :  { %597 = shalt.err (%p895_p8)  }
 0x374   :  { %599 = vsyncmov [#allocation3 + $0x4] }
 0x377   :  { %s600_s2 = vpop.sfrf %599 }
 0x378   :  { %p896_p9 = scmp.ne.s32.totalorder %s600_s2, 0 }
 0x37a   :  { %604 = shalt.err (%p896_p9)  }
 0x37b   :  { %606 = vsyncmov [#allocation3 + $0x5] }
 0x37e   :  { %s607_s3 = vpop.sfrf %606 }
 0x37f   :  { %p897_p12 = scmp.ne.s32.totalorder %s607_s3, 0 }
 0x381   :  { %611 = shalt.err (%p897_p12)  }
 0x382   :  { %613 = vsyncmov [#allocation3 + $0x6] }
 0x385   :  { %s614_s21 = vpop.sfrf %613 }
 0x386   :  { %p898_p13 = scmp.ne.s32.totalorder %s614_s21, 0 }
 0x388   :  { %618 = shalt.err (%p898_p13)  }
 0x389   :  { %620 = vsyncmov [#allocation3 + $0x7] }
 0x38c   :  { %s621_s26 = vpop.sfrf %620 }
 0x38d   :  { %p899_p10 = scmp.ne.s32.totalorder %s621_s26, 0 }
 0x38f   :  { %625 = shalt.err (%p899_p10)  }
 0x390   :  { %627 = vsyncmov [#allocation3 + $0x8] }
 0x393   :  { %s628_s9 = vpop.sfrf %627 }
 0x394   :  { %p900_p0 = scmp.ne.s32.totalorder %s628_s9, 0 }
 0x396   :  { %632 = shalt.err (%p900_p0)  }
 0x397   :  { %634 = vsyncmov [#allocation3 + $0x9] }
 0x39a   :  { %s635_s8 = vpop.sfrf %634 }
 0x39b   :  { %p901_p1 = scmp.ne.s32.totalorder %s635_s8, 0 }
 0x39d   :  { %639 = shalt.err (%p901_p1)  }
 0x39e   :  { %641 = vsyncmov [#allocation3 + $0xa] }
 0x3a1   :  { %s642_s13 = vpop.sfrf %641 }
 0x3a2   :  { %p902_p6 = scmp.ne.s32.totalorder %s642_s13, 0 }
 0x3a4   :  { %646 = shalt.err (%p902_p6)  }
 0x3a5   :  { %648 = vsyncmov [#allocation3 + $0xb] }
 0x3a8   :  { %s649_s15 = vpop.sfrf %648 }
 0x3a9   :  { %p903_p7 = scmp.ne.s32.totalorder %s649_s15, 0 }
 0x3ab   :  { %653 = shalt.err (%p903_p7)  }
 0x3ac   :  { %655 = vsyncmov [#allocation3 + $0xc] }
 0x3af   :  { %s656_s1 = vpop.sfrf %655 }
 0x3b0   :  { %p904_p11 = scmp.ne.s32.totalorder %s656_s1, 0 }
 0x3b2   :  { %660 = shalt.err (%p904_p11)  }
 0x3b3   :  { %662 = vsyncmov [#allocation3 + $0xd] }
 0x3b6   :  { %s663_s6 = vpop.sfrf %662 }
 0x3b7   :  { %p905_p2 = scmp.ne.s32.totalorder %s663_s6, 0 }
 0x3b9   :  { %667 = shalt.err (%p905_p2)  }
 0x3ba   :  { %669 = vsyncmov [#allocation3 + $0xe] }
 0x3bd   :  { %s670_s0 = vpop.sfrf %669 }
 0x3be   :  { %p906_p3 = scmp.ne.s32.totalorder %s670_s0, 0 }
 0x3c0   :  { %674 = shalt.err (%p906_p3)  }
 0x3c1   :  { %676 = vsyncmov [#allocation3 + $0xf] }
 0x3c4   :  { %s677_s4 = vpop.sfrf %676 }
 0x3c5   :  { %p907_p4 = scmp.ne.s32.totalorder %s677_s4, 0 }
 0x3c7   :  { %681 = shalt.err (%p907_p4)  }

</bundles_post_ra>
